<compile_context>
chip_gen: v7x
topology: tpu7x:2x2x1
jax: 0.10.0
libtpu: 0.0.40
codegen_flags: <defaults>
</compile_context>

<pallas_src>
import functools

import jax
import jax.numpy as jnp
from jax.experimental import pallas as pl
from jax.experimental.pallas import tpu as pltpu


# ----------------------------------------------------------------------------
# Kernel factory: every shape constant / slab offset is a Python int.
# ----------------------------------------------------------------------------
def make_kernel(*, F, G, E, H, B, Q, T, CH):
    N = B * Q
    # Row offsets inside the packed (bf16) weight slab.
    o_w1 = 0                      # (F, H)
    o_phi = o_w1 + F              # (E, G)
    o_gate = o_phi + E            # (H+G, 3G)  fused [r|z|n] gate block
    o_hn = o_gate + (H + G)       # (G, G)
    o_w2 = o_hn + G               # (G, G)
    o_w3 = o_w2 + G               # (G, CH)    fc_3, zero-padded to CH lanes
    n_rows = o_w3 + G

    def kernel(states_ref, taus_ref, hx_ref, w_ref, b_ref, out_ref):
        f32 = jnp.float32
        bf16 = jnp.bfloat16
        relu = lambda v: jnp.maximum(v, 0.0)
        dot = lambda a, b: jnp.dot(a, b, preferred_element_type=f32)

        # Weight blocks (bf16) loaded once, reused every step.
        w1 = w_ref[o_w1:o_w1 + F, 0:H]
        wphi = w_ref[o_phi:o_phi + E, 0:G]
        wgate = w_ref[o_gate:o_gate + H + G, 0:3 * G]
        whn = w_ref[o_hn:o_hn + G, 0:G]
        w2 = w_ref[o_w2:o_w2 + G, 0:G]
        w3 = w_ref[o_w3:o_w3 + G, 0:CH]

        b1 = b_ref[0:1, 0:H]
        bphi = b_ref[1:2, 0:G]
        bgate = b_ref[2:3, 0:3 * G]        # [b_ir+b_hr | b_iz+b_hz | b_in]
        bhn = b_ref[3:4, 0:G]
        b2 = b_ref[4:5, 0:G]
        b3 = b_ref[5:6, 0:CH]

        # pi * arange(E), built in-kernel (no HBM constant).
        k = jax.lax.broadcasted_iota(jnp.int32, (N, E), 1).astype(f32)
        pik = jnp.pi * k

        h = hx_ref[...]                    # (N, G) f32, carried across steps
        chunks = []
        for t in range(T):                 # static unroll; T is small
            # --- quantile embedding: relu(cos(tau * pi*k) @ Wphi + bphi) ----
            cos_tau = jnp.cos(taus_ref[t] * pik)                      # (N, E)
            phi = relu(dot(cos_tau.astype(bf16), wphi) + bphi)        # (N, G)

            # --- fc_1: replicate each batch row Q times in-kernel -----------
            st = states_ref[t]                                        # (B, F)
            st_tile = jnp.concatenate(
                [jnp.broadcast_to(st[b:b + 1, :], (Q, F)) for b in range(B)],
                axis=0)                                               # (N, F)
            x = relu(dot(st_tile.astype(bf16), w1) + b1)              # (N, H)

            # --- GRUCell: fused [x|h] gate matmul + separate h_n push -------
            xh = jnp.concatenate([x, h], axis=1).astype(bf16)         # (N, H+G)
            gates = dot(xh, wgate) + bgate                            # (N, 3G)
            r = jax.nn.sigmoid(gates[:, 0:G])
            z = jax.nn.sigmoid(gates[:, G:2 * G])
            hn = dot(h.astype(bf16), whn) + bhn                       # (N, G)
            n = jnp.tanh(gates[:, 2 * G:3 * G] + r * hn)
            h = (1.0 - z) * n + z * h                                 # (N, G)

            # --- residual fc_2, quantile modulation, fc_3 --------------------
            x2 = h + relu(dot(h.astype(bf16), w2) + b2)
            # w3/b3 zero-padded to CH lanes: q is (N, CH), real lanes [0:F).
            q = dot((x2 * phi).astype(bf16), w3) + b3                 # (N, CH)
            chunks.append(q)

        chunks.append(h)                   # final hidden state, last chunk
        out_ref[...] = jnp.concatenate(chunks, axis=1)   # one dense store

    return kernel, n_rows


# ----------------------------------------------------------------------------
# One-time host-side parameter repack (NOT part of the jitted hot path).
# ----------------------------------------------------------------------------
def pack_params(params, *, lanes=128):
    (wphi, bphi, w1, b1, wih, bih, whh, bhh, w2, b2, w3, b3) = params
    F, H = w1.shape
    E, G = wphi.shape
    CH = max(F, G)
    assert max(H, 3 * G, CH) <= lanes

    def padw(m):
        return jnp.pad(m, ((0, 0), (0, lanes - m.shape[1])))

    # PyTorch GRUCell gate order: r, z, n.
    wir, wiz, win = wih[:, 0:G], wih[:, G:2 * G], wih[:, 2 * G:3 * G]
    whr, whz, whn = whh[:, 0:G], whh[:, G:2 * G], whh[:, 2 * G:3 * G]
    # Fused gate block: rows [0:H) input weights, rows [H:H+G) hidden weights
    # with the n-columns zeroed (h_n must stay separate because of r * h_n).
    gate_top = jnp.concatenate([wir, wiz, win], axis=1)                 # (H, 3G)
    gate_bot = jnp.concatenate([whr, whz, jnp.zeros((G, G), jnp.float32)],
                               axis=1)                                  # (G, 3G)
    wgate = jnp.concatenate([gate_top, gate_bot], axis=0)               # (H+G, 3G)

    w3p = jnp.pad(w3, ((0, 0), (0, CH - F)))                            # (G, CH)

    w_slab = jnp.concatenate(
        [padw(w1), padw(wphi), padw(wgate), padw(whn), padw(w2), padw(w3p)],
        axis=0).astype(jnp.bfloat16)

    b_gate = jnp.concatenate([bih[:, 0:G] + bhh[:, 0:G],
                              bih[:, G:2 * G] + bhh[:, G:2 * G],
                              bih[:, 2 * G:3 * G]], axis=1)             # (1, 3G)
    b_hn = bhh[:, 2 * G:3 * G]
    b3p = jnp.pad(b3, ((0, 0), (0, CH - F)))
    b_slab = jnp.concatenate(
        [padw(b1), padw(bphi), padw(b_gate), padw(b_hn), padw(b2), padw(b3p)],
        axis=0).astype(jnp.float32)
    return w_slab, b_slab


# ----------------------------------------------------------------------------
# Wrapper: single grid-less pallas_call over the whole T-step sequence.
# ----------------------------------------------------------------------------
def iqn_forward(states, taus, hx, w_slab, b_slab, *, num_quantiles, dims):
    F, G, E, H = dims
    T, B, _ = states.shape
    Q = num_quantiles
    N = B * Q
    CH = max(F, G)
    assert N % 8 == 0, "B * num_quantiles should be a multiple of 8 (sublanes)"

    kernel, n_rows = make_kernel(F=F, G=G, E=E, H=H, B=B, Q=Q, T=T, CH=CH)
    assert w_slab.shape[0] == n_rows

    vmem = pl.BlockSpec(memory_space=pltpu.MemorySpace.VMEM)
    out_w = T * CH + G

    packed = pl.pallas_call(
        kernel,
        out_shape=jax.ShapeDtypeStruct((N, out_w), jnp.float32),
        in_specs=[vmem, vmem, vmem, vmem, vmem],
        out_specs=vmem,
    )(states.astype(jnp.float32), taus.astype(jnp.float32),
      hx.astype(jnp.float32), w_slab, b_slab)

    # Layout glue (view/transpose) outside the kernel.
    z = jnp.stack(
        [packed[:, t * CH:t * CH + F].reshape(B, Q, F).transpose(0, 2, 1)
         for t in range(T)], axis=0)                      # (T, B, F, Q)
    ghx = packed[:, T * CH:T * CH + G]                    # (N, G)
    return z, ghx


# ----------------------------------------------------------------------------
# Deterministic synthetic parameter init (mirrors module __init__ shapes).
# Weight matrices are stored pre-transposed as (in_features, out_features).
# ----------------------------------------------------------------------------
def init_params(key, feature_len, gru_size, quantile_embedding_dim, fc1_units):
    keys = jax.random.split(key, 12)

    def xavier(k, fan_in, fan_out):
        bound = jnp.sqrt(6.0 / (fan_in + fan_out))
        return jax.random.uniform(k, (fan_in, fan_out), jnp.float32, -bound, bound)

    def unif(k, shape, bound):
        return jax.random.uniform(k, shape, jnp.float32, -bound, bound)

    F, G, E, H = feature_len, gru_size, quantile_embedding_dim, fc1_units
    g_std = 1.0 / jnp.sqrt(G)

    wphi = xavier(keys[0], E, G)
    bphi = unif(keys[1], (1, G), 1.0 / jnp.sqrt(E))
    w1 = xavier(keys[2], F, H)
    b1 = unif(keys[3], (1, H), 1.0 / jnp.sqrt(F))
    wih = unif(keys[4], (H, 3 * G), g_std)          # GRUCell weight_ih^T
    bih = unif(keys[5], (1, 3 * G), g_std)
    whh = unif(keys[6], (G, 3 * G), g_std)          # GRUCell weight_hh^T
    bhh = unif(keys[7], (1, 3 * G), g_std)
    w2 = xavier(keys[8], G, G)
    b2 = unif(keys[9], (1, G), 1.0 / jnp.sqrt(G))
    w3 = xavier(keys[10], G, F)
    b3 = unif(keys[11], (1, F), 1.0 / jnp.sqrt(G))
    return (wphi, bphi, w1, b1, wih, bih, whh, bhh, w2, b2, w3, b3)


# ----------------------------------------------------------------------------
# Pure-JAX f32 reference: T single-step module forwards, carrying hx.
# ----------------------------------------------------------------------------
def ref_step(state, hx, tau, params, Q):
    (wphi, bphi, w1, b1, wih, bih, whh, bhh, w2, b2, w3, b3) = params
    B, F = state.shape
    E, G = wphi.shape
    N = B * Q

    tau_e = jnp.broadcast_to(tau, (N, E))
    pi_mtx = jnp.pi * jnp.arange(E, dtype=jnp.float32)
    cos_tau = jnp.cos(tau_e * pi_mtx)
    phi = jax.nn.relu(cos_tau @ wphi + bphi)

    state_tile = jnp.broadcast_to(state[:, None, :], (B, Q, F)).reshape(N, F)
    x = jax.nn.relu(state_tile @ w1 + b1)
    gi = x @ wih + bih
    gh = hx @ whh + bhh
    i_r, i_z, i_n = gi[:, :G], gi[:, G:2 * G], gi[:, 2 * G:]
    h_r, h_z, h_n = gh[:, :G], gh[:, G:2 * G], gh[:, 2 * G:]
    r = jax.nn.sigmoid(i_r + h_r)
    zg = jax.nn.sigmoid(i_z + h_z)
    n = jnp.tanh(i_n + r * h_n)
    ghx = (1.0 - zg) * n + zg * hx
    x2 = ghx + jax.nn.relu(ghx @ w2 + b2)
    out = (x2 * phi) @ w3 + b3
    z = out.reshape(B, Q, F).transpose(0, 2, 1)
    return z, ghx


def ref_forward_seq(states, taus, hx, params, num_quantiles):
    zs = []
    h = hx
    for t in range(states.shape[0]):
        z, h = ref_step(states[t], h, taus[t], params, num_quantiles)
        zs.append(z)
    return jnp.stack(zs, axis=0), h


if __name__ == "__main__":
    # Small shapes consistent with the module.
    feature_len = 16
    gru_size = 32
    quantile_embedding_dim = 64
    fc1_units = 64
    num_quantiles = 8
    batch = 2
    seq_len = 4
    N = batch * num_quantiles

    key = jax.random.PRNGKey(0)
    k_p, k_s, k_h, k_t = jax.random.split(key, 4)

    params = init_params(k_p, feature_len, gru_size, quantile_embedding_dim, fc1_units)
    states = jax.random.normal(k_s, (seq_len, batch, feature_len), jnp.float32)
    hx = jax.random.normal(k_h, (N, gru_size), jnp.float32)
    taus = jax.random.uniform(k_t, (seq_len, N, 1), jnp.float32)

    # One-time parameter repack (bf16 weight slab, f32 bias slab).
    w_slab, b_slab = pack_params(params)
    w_slab = jax.device_put(w_slab)
    b_slab = jax.device_put(b_slab)

    fwd = jax.jit(functools.partial(
        iqn_forward,
        num_quantiles=num_quantiles,
        dims=(feature_len, gru_size, quantile_embedding_dim, fc1_units)))

    z, ghx = fwd(states, taus, hx, w_slab, b_slab)
    jax.block_until_ready((z, ghx))

    z_ref, ghx_ref = ref_forward_seq(states, taus, hx, params, num_quantiles)
    assert z.shape == (seq_len, batch, feature_len, num_quantiles)
    assert ghx.shape == (N, gru_size)
    # bf16 MXU operands vs f32 reference -> loosened tolerance (per review).
    assert jnp.allclose(z, z_ref, rtol=3e-2, atol=3e-2), \
        float(jnp.max(jnp.abs(z - z_ref)))
    assert jnp.allclose(ghx, ghx_ref, rtol=3e-2, atol=3e-2), \
        float(jnp.max(jnp.abs(ghx - ghx_ref)))

    print("KERNEL_OK")
</pallas_src>

<mosaic_0001>
module attributes {stable_mosaic.version = 11 : i64} {
  func.func @kernel(%arg0: memref<4x2x16xf32, #tpu.memory_space<vmem>>, %arg1: memref<4x16x1xf32, #tpu.memory_space<vmem>>, %arg2: memref<16x32xf32, #tpu.memory_space<vmem>>, %arg3: memref<272x128xbf16, #tpu.memory_space<vmem>>, %arg4: memref<6x128xf32, #tpu.memory_space<vmem>>, %arg5: memref<16x160xf32, #tpu.memory_space<vmem>>) attributes {dimension_semantics = [], scalar_prefetch = 0 : i64, scratch_operands = 0 : i64, tpu.core_type = #tpu.core_type<tc>} {
    %c0 = arith.constant 0 : index
    %c0_0 = arith.constant 0 : index
    %0 = vector.load %arg3[%c0, %c0_0] : memref<272x128xbf16, #tpu.memory_space<vmem>>, vector<16x64xbf16>
    %c16 = arith.constant 16 : index
    %c0_1 = arith.constant 0 : index
    %1 = vector.load %arg3[%c16, %c0_1] : memref<272x128xbf16, #tpu.memory_space<vmem>>, vector<64x32xbf16>
    %c80 = arith.constant 80 : index
    %c0_2 = arith.constant 0 : index
    %2 = vector.load %arg3[%c80, %c0_2] : memref<272x128xbf16, #tpu.memory_space<vmem>>, vector<96x96xbf16>
    %c176 = arith.constant 176 : index
    %c0_3 = arith.constant 0 : index
    %3 = vector.load %arg3[%c176, %c0_3] : memref<272x128xbf16, #tpu.memory_space<vmem>>, vector<32x32xbf16>
    %c208 = arith.constant 208 : index
    %c0_4 = arith.constant 0 : index
    %4 = vector.load %arg3[%c208, %c0_4] : memref<272x128xbf16, #tpu.memory_space<vmem>>, vector<32x32xbf16>
    %c240 = arith.constant 240 : index
    %c0_5 = arith.constant 0 : index
    %5 = vector.load %arg3[%c240, %c0_5] : memref<272x128xbf16, #tpu.memory_space<vmem>>, vector<32x32xbf16>
    %c0_6 = arith.constant 0 : index
    %c0_7 = arith.constant 0 : index
    %6 = vector.load %arg4[%c0_6, %c0_7] : memref<6x128xf32, #tpu.memory_space<vmem>>, vector<1x64xf32>
    %c1 = arith.constant 1 : index
    %c0_8 = arith.constant 0 : index
    %7 = vector.load %arg4[%c1, %c0_8] : memref<6x128xf32, #tpu.memory_space<vmem>>, vector<1x32xf32>
    %c2 = arith.constant 2 : index
    %c0_9 = arith.constant 0 : index
    %8 = vector.load %arg4[%c2, %c0_9] : memref<6x128xf32, #tpu.memory_space<vmem>>, vector<1x96xf32>
    %c3 = arith.constant 3 : index
    %c0_10 = arith.constant 0 : index
    %9 = vector.load %arg4[%c3, %c0_10] : memref<6x128xf32, #tpu.memory_space<vmem>>, vector<1x32xf32>
    %c4 = arith.constant 4 : index
    %c0_11 = arith.constant 0 : index
    %10 = vector.load %arg4[%c4, %c0_11] : memref<6x128xf32, #tpu.memory_space<vmem>>, vector<1x32xf32>
    %c5 = arith.constant 5 : index
    %c0_12 = arith.constant 0 : index
    %11 = vector.load %arg4[%c5, %c0_12] : memref<6x128xf32, #tpu.memory_space<vmem>>, vector<1x32xf32>
    %12 = tpu.iota {dimensions = array<i32: 1>} : vector<16x64xi32>
    %13 = arith.sitofp %12 : vector<16x64xi32> to vector<16x64xf32>
    %cst = arith.constant 3.14159274 : f32
    %14 = vector.broadcast %cst : f32 to vector<16x64xf32>
    %15 = arith.mulf %14, %13 : vector<16x64xf32>
    %c0_13 = arith.constant 0 : index
    %c0_14 = arith.constant 0 : index
    %16 = vector.load %arg2[%c0_13, %c0_14] : memref<16x32xf32, #tpu.memory_space<vmem>>, vector<16x32xf32>
    %c0_15 = arith.constant 0 : index
    %c0_16 = arith.constant 0 : index
    %c0_17 = arith.constant 0 : index
    %17 = vector.load %arg1[%c0_15, %c0_16, %c0_17] : memref<4x16x1xf32, #tpu.memory_space<vmem>>, vector<1x16x1xf32>
    %18 = vector.shape_cast %17 : vector<1x16x1xf32> to vector<16x1xf32>
    %19 = vector.broadcast %18 : vector<16x1xf32> to vector<16x64xf32>
    %20 = arith.mulf %19, %15 : vector<16x64xf32>
    %21 = math.cos %20 : vector<16x64xf32>
    %22 = arith.truncf %21 : vector<16x64xf32> to vector<16x64xbf16>
    %cst_18 = arith.constant dense<0.000000e+00> : vector<16x32xf32>
    %23 = tpu.matmul %22, %1, %cst_18 {dimension_numbers = #tpu.dot_dimension_numbers<[1], [0], [0], [1], [0, 0, 1, 1], [], []>} : vector<16x64xbf16>, vector<64x32xbf16>, vector<16x32xf32> -> vector<16x32xf32>
    %24 = vector.broadcast %7 : vector<1x32xf32> to vector<16x32xf32>
    %25 = arith.addf %23, %24 : vector<16x32xf32>
    %cst_19 = arith.constant 0.000000e+00 : f32
    %26 = vector.broadcast %cst_19 : f32 to vector<16x32xf32>
    %27 = arith.maximumf %25, %26 : vector<16x32xf32>
    %c0_20 = arith.constant 0 : index
    %c0_21 = arith.constant 0 : index
    %c0_22 = arith.constant 0 : index
    %28 = vector.load %arg0[%c0_20, %c0_21, %c0_22] : memref<4x2x16xf32, #tpu.memory_space<vmem>>, vector<1x2x16xf32>
    %29 = vector.shape_cast %28 : vector<1x2x16xf32> to vector<2x16xf32>
    %30 = vector.extract_strided_slice %29 {offsets = [0, 0], sizes = [1, 16], strides = [1, 1]} : vector<2x16xf32> to vector<1x16xf32>
    %31 = vector.shape_cast %30 : vector<1x16xf32> to vector<1x16xf32>
    %32 = vector.broadcast %31 : vector<1x16xf32> to vector<8x16xf32>
    %33 = vector.extract_strided_slice %29 {offsets = [1, 0], sizes = [1, 16], strides = [1, 1]} : vector<2x16xf32> to vector<1x16xf32>
    %34 = vector.shape_cast %33 : vector<1x16xf32> to vector<1x16xf32>
    %35 = vector.broadcast %34 : vector<1x16xf32> to vector<8x16xf32>
    %36 = tpu.concatenate %32, %35 in 0 : vector<8x16xf32>, vector<8x16xf32> -> vector<16x16xf32>
    %37 = arith.truncf %36 : vector<16x16xf32> to vector<16x16xbf16>
    %cst_23 = arith.constant dense<0.000000e+00> : vector<16x64xf32>
    %38 = tpu.matmul %37, %0, %cst_23 {dimension_numbers = #tpu.dot_dimension_numbers<[1], [0], [0], [1], [0, 0, 1, 1], [], []>} : vector<16x16xbf16>, vector<16x64xbf16>, vector<16x64xf32> -> vector<16x64xf32>
    %39 = vector.broadcast %6 : vector<1x64xf32> to vector<16x64xf32>
    %40 = arith.addf %38, %39 : vector<16x64xf32>
    %cst_24 = arith.constant 0.000000e+00 : f32
    %41 = vector.broadcast %cst_24 : f32 to vector<16x64xf32>
    %42 = arith.maximumf %40, %41 : vector<16x64xf32>
    %43 = tpu.concatenate %42, %16 in 1 : vector<16x64xf32>, vector<16x32xf32> -> vector<16x96xf32>
    %44 = arith.truncf %43 : vector<16x96xf32> to vector<16x96xbf16>
    %cst_25 = arith.constant dense<0.000000e+00> : vector<16x96xf32>
    %45 = tpu.matmul %44, %2, %cst_25 {dimension_numbers = #tpu.dot_dimension_numbers<[1], [0], [0], [1], [0, 0, 1, 1], [], []>} : vector<16x96xbf16>, vector<96x96xbf16>, vector<16x96xf32> -> vector<16x96xf32>
    %46 = vector.broadcast %8 : vector<1x96xf32> to vector<16x96xf32>
    %47 = arith.addf %45, %46 : vector<16x96xf32>
    %48 = vector.extract_strided_slice %47 {offsets = [0, 0], sizes = [16, 32], strides = [1, 1]} : vector<16x96xf32> to vector<16x32xf32>
    %49 = arith.negf %48 : vector<16x32xf32>
    %50 = math.exp %49 : vector<16x32xf32>
    %cst_26 = arith.constant 1.000000e+00 : f32
    %51 = vector.broadcast %cst_26 : f32 to vector<16x32xf32>
    %52 = arith.addf %51, %50 : vector<16x32xf32>
    %53 = arith.divf %51, %52 : vector<16x32xf32>
    %54 = vector.extract_strided_slice %47 {offsets = [0, 32], sizes = [16, 32], strides = [1, 1]} : vector<16x96xf32> to vector<16x32xf32>
    %55 = arith.negf %54 : vector<16x32xf32>
    %56 = math.exp %55 : vector<16x32xf32>
    %cst_27 = arith.constant 1.000000e+00 : f32
    %57 = vector.broadcast %cst_27 : f32 to vector<16x32xf32>
    %58 = arith.addf %57, %56 : vector<16x32xf32>
    %59 = arith.divf %57, %58 : vector<16x32xf32>
    %60 = arith.truncf %16 : vector<16x32xf32> to vector<16x32xbf16>
    %cst_28 = arith.constant dense<0.000000e+00> : vector<16x32xf32>
    %61 = tpu.matmul %60, %3, %cst_28 {dimension_numbers = #tpu.dot_dimension_numbers<[1], [0], [0], [1], [0, 0, 1, 1], [], []>} : vector<16x32xbf16>, vector<32x32xbf16>, vector<16x32xf32> -> vector<16x32xf32>
    %62 = vector.broadcast %9 : vector<1x32xf32> to vector<16x32xf32>
    %63 = arith.addf %61, %62 : vector<16x32xf32>
    %64 = vector.extract_strided_slice %47 {offsets = [0, 64], sizes = [16, 32], strides = [1, 1]} : vector<16x96xf32> to vector<16x32xf32>
    %65 = arith.mulf %53, %63 : vector<16x32xf32>
    %66 = arith.addf %64, %65 : vector<16x32xf32>
    %67 = math.tanh %66 : vector<16x32xf32>
    %cst_29 = arith.constant 1.000000e+00 : f32
    %68 = vector.broadcast %cst_29 : f32 to vector<16x32xf32>
    %69 = arith.subf %68, %59 : vector<16x32xf32>
    %70 = arith.mulf %69, %67 : vector<16x32xf32>
    %71 = arith.mulf %59, %16 : vector<16x32xf32>
    %72 = arith.addf %70, %71 : vector<16x32xf32>
    %73 = arith.truncf %72 : vector<16x32xf32> to vector<16x32xbf16>
    %cst_30 = arith.constant dense<0.000000e+00> : vector<16x32xf32>
    %74 = tpu.matmul %73, %4, %cst_30 {dimension_numbers = #tpu.dot_dimension_numbers<[1], [0], [0], [1], [0, 0, 1, 1], [], []>} : vector<16x32xbf16>, vector<32x32xbf16>, vector<16x32xf32> -> vector<16x32xf32>
    %75 = vector.broadcast %10 : vector<1x32xf32> to vector<16x32xf32>
    %76 = arith.addf %74, %75 : vector<16x32xf32>
    %cst_31 = arith.constant 0.000000e+00 : f32
    %77 = vector.broadcast %cst_31 : f32 to vector<16x32xf32>
    %78 = arith.maximumf %76, %77 : vector<16x32xf32>
    %79 = arith.addf %72, %78 : vector<16x32xf32>
    %80 = arith.mulf %79, %27 : vector<16x32xf32>
    %81 = arith.truncf %80 : vector<16x32xf32> to vector<16x32xbf16>
    %cst_32 = arith.constant dense<0.000000e+00> : vector<16x32xf32>
    %82 = tpu.matmul %81, %5, %cst_32 {dimension_numbers = #tpu.dot_dimension_numbers<[1], [0], [0], [1], [0, 0, 1, 1], [], []>} : vector<16x32xbf16>, vector<32x32xbf16>, vector<16x32xf32> -> vector<16x32xf32>
    %83 = vector.broadcast %11 : vector<1x32xf32> to vector<16x32xf32>
    %84 = arith.addf %82, %83 : vector<16x32xf32>
    %c1_33 = arith.constant 1 : index
    %c0_34 = arith.constant 0 : index
    %c0_35 = arith.constant 0 : index
    %85 = vector.load %arg1[%c1_33, %c0_34, %c0_35] : memref<4x16x1xf32, #tpu.memory_space<vmem>>, vector<1x16x1xf32>
    %86 = vector.shape_cast %85 : vector<1x16x1xf32> to vector<16x1xf32>
    %87 = vector.broadcast %86 : vector<16x1xf32> to vector<16x64xf32>
    %88 = arith.mulf %87, %15 : vector<16x64xf32>
    %89 = math.cos %88 : vector<16x64xf32>
    %90 = arith.truncf %89 : vector<16x64xf32> to vector<16x64xbf16>
    %cst_36 = arith.constant dense<0.000000e+00> : vector<16x32xf32>
    %91 = tpu.matmul %90, %1, %cst_36 {dimension_numbers = #tpu.dot_dimension_numbers<[1], [0], [0], [1], [0, 0, 1, 1], [], []>} : vector<16x64xbf16>, vector<64x32xbf16>, vector<16x32xf32> -> vector<16x32xf32>
    %92 = vector.broadcast %7 : vector<1x32xf32> to vector<16x32xf32>
    %93 = arith.addf %91, %92 : vector<16x32xf32>
    %cst_37 = arith.constant 0.000000e+00 : f32
    %94 = vector.broadcast %cst_37 : f32 to vector<16x32xf32>
    %95 = arith.maximumf %93, %94 : vector<16x32xf32>
    %c1_38 = arith.constant 1 : index
    %c0_39 = arith.constant 0 : index
    %c0_40 = arith.constant 0 : index
    %96 = vector.load %arg0[%c1_38, %c0_39, %c0_40] : memref<4x2x16xf32, #tpu.memory_space<vmem>>, vector<1x2x16xf32>
    %97 = vector.shape_cast %96 : vector<1x2x16xf32> to vector<2x16xf32>
    %98 = vector.extract_strided_slice %97 {offsets = [0, 0], sizes = [1, 16], strides = [1, 1]} : vector<2x16xf32> to vector<1x16xf32>
    %99 = vector.shape_cast %98 : vector<1x16xf32> to vector<1x16xf32>
    %100 = vector.broadcast %99 : vector<1x16xf32> to vector<8x16xf32>
    %101 = vector.extract_strided_slice %97 {offsets = [1, 0], sizes = [1, 16], strides = [1, 1]} : vector<2x16xf32> to vector<1x16xf32>
    %102 = vector.shape_cast %101 : vector<1x16xf32> to vector<1x16xf32>
    %103 = vector.broadcast %102 : vector<1x16xf32> to vector<8x16xf32>
    %104 = tpu.concatenate %100, %103 in 0 : vector<8x16xf32>, vector<8x16xf32> -> vector<16x16xf32>
    %105 = arith.truncf %104 : vector<16x16xf32> to vector<16x16xbf16>
    %cst_41 = arith.constant dense<0.000000e+00> : vector<16x64xf32>
    %106 = tpu.matmul %105, %0, %cst_41 {dimension_numbers = #tpu.dot_dimension_numbers<[1], [0], [0], [1], [0, 0, 1, 1], [], []>} : vector<16x16xbf16>, vector<16x64xbf16>, vector<16x64xf32> -> vector<16x64xf32>
    %107 = vector.broadcast %6 : vector<1x64xf32> to vector<16x64xf32>
    %108 = arith.addf %106, %107 : vector<16x64xf32>
    %cst_42 = arith.constant 0.000000e+00 : f32
    %109 = vector.broadcast %cst_42 : f32 to vector<16x64xf32>
    %110 = arith.maximumf %108, %109 : vector<16x64xf32>
    %111 = tpu.concatenate %110, %72 in 1 : vector<16x64xf32>, vector<16x32xf32> -> vector<16x96xf32>
    %112 = arith.truncf %111 : vector<16x96xf32> to vector<16x96xbf16>
    %cst_43 = arith.constant dense<0.000000e+00> : vector<16x96xf32>
    %113 = tpu.matmul %112, %2, %cst_43 {dimension_numbers = #tpu.dot_dimension_numbers<[1], [0], [0], [1], [0, 0, 1, 1], [], []>} : vector<16x96xbf16>, vector<96x96xbf16>, vector<16x96xf32> -> vector<16x96xf32>
    %114 = vector.broadcast %8 : vector<1x96xf32> to vector<16x96xf32>
    %115 = arith.addf %113, %114 : vector<16x96xf32>
    %116 = vector.extract_strided_slice %115 {offsets = [0, 0], sizes = [16, 32], strides = [1, 1]} : vector<16x96xf32> to vector<16x32xf32>
    %117 = arith.negf %116 : vector<16x32xf32>
    %118 = math.exp %117 : vector<16x32xf32>
    %cst_44 = arith.constant 1.000000e+00 : f32
    %119 = vector.broadcast %cst_44 : f32 to vector<16x32xf32>
    %120 = arith.addf %119, %118 : vector<16x32xf32>
    %121 = arith.divf %119, %120 : vector<16x32xf32>
    %122 = vector.extract_strided_slice %115 {offsets = [0, 32], sizes = [16, 32], strides = [1, 1]} : vector<16x96xf32> to vector<16x32xf32>
    %123 = arith.negf %122 : vector<16x32xf32>
    %124 = math.exp %123 : vector<16x32xf32>
    %cst_45 = arith.constant 1.000000e+00 : f32
    %125 = vector.broadcast %cst_45 : f32 to vector<16x32xf32>
    %126 = arith.addf %125, %124 : vector<16x32xf32>
    %127 = arith.divf %125, %126 : vector<16x32xf32>
    %128 = arith.truncf %72 : vector<16x32xf32> to vector<16x32xbf16>
    %cst_46 = arith.constant dense<0.000000e+00> : vector<16x32xf32>
    %129 = tpu.matmul %128, %3, %cst_46 {dimension_numbers = #tpu.dot_dimension_numbers<[1], [0], [0], [1], [0, 0, 1, 1], [], []>} : vector<16x32xbf16>, vector<32x32xbf16>, vector<16x32xf32> -> vector<16x32xf32>
    %130 = vector.broadcast %9 : vector<1x32xf32> to vector<16x32xf32>
    %131 = arith.addf %129, %130 : vector<16x32xf32>
    %132 = vector.extract_strided_slice %115 {offsets = [0, 64], sizes = [16, 32], strides = [1, 1]} : vector<16x96xf32> to vector<16x32xf32>
    %133 = arith.mulf %121, %131 : vector<16x32xf32>
    %134 = arith.addf %132, %133 : vector<16x32xf32>
    %135 = math.tanh %134 : vector<16x32xf32>
    %cst_47 = arith.constant 1.000000e+00 : f32
    %136 = vector.broadcast %cst_47 : f32 to vector<16x32xf32>
    %137 = arith.subf %136, %127 : vector<16x32xf32>
    %138 = arith.mulf %137, %135 : vector<16x32xf32>
    %139 = arith.mulf %127, %72 : vector<16x32xf32>
    %140 = arith.addf %138, %139 : vector<16x32xf32>
    %141 = arith.truncf %140 : vector<16x32xf32> to vector<16x32xbf16>
    %cst_48 = arith.constant dense<0.000000e+00> : vector<16x32xf32>
    %142 = tpu.matmul %141, %4, %cst_48 {dimension_numbers = #tpu.dot_dimension_numbers<[1], [0], [0], [1], [0, 0, 1, 1], [], []>} : vector<16x32xbf16>, vector<32x32xbf16>, vector<16x32xf32> -> vector<16x32xf32>
    %143 = vector.broadcast %10 : vector<1x32xf32> to vector<16x32xf32>
    %144 = arith.addf %142, %143 : vector<16x32xf32>
    %cst_49 = arith.constant 0.000000e+00 : f32
    %145 = vector.broadcast %cst_49 : f32 to vector<16x32xf32>
    %146 = arith.maximumf %144, %145 : vector<16x32xf32>
    %147 = arith.addf %140, %146 : vector<16x32xf32>
    %148 = arith.mulf %147, %95 : vector<16x32xf32>
    %149 = arith.truncf %148 : vector<16x32xf32> to vector<16x32xbf16>
    %cst_50 = arith.constant dense<0.000000e+00> : vector<16x32xf32>
    %150 = tpu.matmul %149, %5, %cst_50 {dimension_numbers = #tpu.dot_dimension_numbers<[1], [0], [0], [1], [0, 0, 1, 1], [], []>} : vector<16x32xbf16>, vector<32x32xbf16>, vector<16x32xf32> -> vector<16x32xf32>
    %151 = vector.broadcast %11 : vector<1x32xf32> to vector<16x32xf32>
    %152 = arith.addf %150, %151 : vector<16x32xf32>
    %c2_51 = arith.constant 2 : index
    %c0_52 = arith.constant 0 : index
    %c0_53 = arith.constant 0 : index
    %153 = vector.load %arg1[%c2_51, %c0_52, %c0_53] : memref<4x16x1xf32, #tpu.memory_space<vmem>>, vector<1x16x1xf32>
    %154 = vector.shape_cast %153 : vector<1x16x1xf32> to vector<16x1xf32>
    %155 = vector.broadcast %154 : vector<16x1xf32> to vector<16x64xf32>
    %156 = arith.mulf %155, %15 : vector<16x64xf32>
    %157 = math.cos %156 : vector<16x64xf32>
    %158 = arith.truncf %157 : vector<16x64xf32> to vector<16x64xbf16>
    %cst_54 = arith.constant dense<0.000000e+00> : vector<16x32xf32>
    %159 = tpu.matmul %158, %1, %cst_54 {dimension_numbers = #tpu.dot_dimension_numbers<[1], [0], [0], [1], [0, 0, 1, 1], [], []>} : vector<16x64xbf16>, vector<64x32xbf16>, vector<16x32xf32> -> vector<16x32xf32>
    %160 = vector.broadcast %7 : vector<1x32xf32> to vector<16x32xf32>
    %161 = arith.addf %159, %160 : vector<16x32xf32>
    %cst_55 = arith.constant 0.000000e+00 : f32
    %162 = vector.broadcast %cst_55 : f32 to vector<16x32xf32>
    %163 = arith.maximumf %161, %162 : vector<16x32xf32>
    %c2_56 = arith.constant 2 : index
    %c0_57 = arith.constant 0 : index
    %c0_58 = arith.constant 0 : index
    %164 = vector.load %arg0[%c2_56, %c0_57, %c0_58] : memref<4x2x16xf32, #tpu.memory_space<vmem>>, vector<1x2x16xf32>
    %165 = vector.shape_cast %164 : vector<1x2x16xf32> to vector<2x16xf32>
    %166 = vector.extract_strided_slice %165 {offsets = [0, 0], sizes = [1, 16], strides = [1, 1]} : vector<2x16xf32> to vector<1x16xf32>
    %167 = vector.shape_cast %166 : vector<1x16xf32> to vector<1x16xf32>
    %168 = vector.broadcast %167 : vector<1x16xf32> to vector<8x16xf32>
    %169 = vector.extract_strided_slice %165 {offsets = [1, 0], sizes = [1, 16], strides = [1, 1]} : vector<2x16xf32> to vector<1x16xf32>
    %170 = vector.shape_cast %169 : vector<1x16xf32> to vector<1x16xf32>
    %171 = vector.broadcast %170 : vector<1x16xf32> to vector<8x16xf32>
    %172 = tpu.concatenate %168, %171 in 0 : vector<8x16xf32>, vector<8x16xf32> -> vector<16x16xf32>
    %173 = arith.truncf %172 : vector<16x16xf32> to vector<16x16xbf16>
    %cst_59 = arith.constant dense<0.000000e+00> : vector<16x64xf32>
    %174 = tpu.matmul %173, %0, %cst_59 {dimension_numbers = #tpu.dot_dimension_numbers<[1], [0], [0], [1], [0, 0, 1, 1], [], []>} : vector<16x16xbf16>, vector<16x64xbf16>, vector<16x64xf32> -> vector<16x64xf32>
    %175 = vector.broadcast %6 : vector<1x64xf32> to vector<16x64xf32>
    %176 = arith.addf %174, %175 : vector<16x64xf32>
    %cst_60 = arith.constant 0.000000e+00 : f32
    %177 = vector.broadcast %cst_60 : f32 to vector<16x64xf32>
    %178 = arith.maximumf %176, %177 : vector<16x64xf32>
    %179 = tpu.concatenate %178, %140 in 1 : vector<16x64xf32>, vector<16x32xf32> -> vector<16x96xf32>
    %180 = arith.truncf %179 : vector<16x96xf32> to vector<16x96xbf16>
    %cst_61 = arith.constant dense<0.000000e+00> : vector<16x96xf32>
    %181 = tpu.matmul %180, %2, %cst_61 {dimension_numbers = #tpu.dot_dimension_numbers<[1], [0], [0], [1], [0, 0, 1, 1], [], []>} : vector<16x96xbf16>, vector<96x96xbf16>, vector<16x96xf32> -> vector<16x96xf32>
    %182 = vector.broadcast %8 : vector<1x96xf32> to vector<16x96xf32>
    %183 = arith.addf %181, %182 : vector<16x96xf32>
    %184 = vector.extract_strided_slice %183 {offsets = [0, 0], sizes = [16, 32], strides = [1, 1]} : vector<16x96xf32> to vector<16x32xf32>
    %185 = arith.negf %184 : vector<16x32xf32>
    %186 = math.exp %185 : vector<16x32xf32>
    %cst_62 = arith.constant 1.000000e+00 : f32
    %187 = vector.broadcast %cst_62 : f32 to vector<16x32xf32>
    %188 = arith.addf %187, %186 : vector<16x32xf32>
    %189 = arith.divf %187, %188 : vector<16x32xf32>
    %190 = vector.extract_strided_slice %183 {offsets = [0, 32], sizes = [16, 32], strides = [1, 1]} : vector<16x96xf32> to vector<16x32xf32>
    %191 = arith.negf %190 : vector<16x32xf32>
    %192 = math.exp %191 : vector<16x32xf32>
    %cst_63 = arith.constant 1.000000e+00 : f32
    %193 = vector.broadcast %cst_63 : f32 to vector<16x32xf32>
    %194 = arith.addf %193, %192 : vector<16x32xf32>
    %195 = arith.divf %193, %194 : vector<16x32xf32>
    %196 = arith.truncf %140 : vector<16x32xf32> to vector<16x32xbf16>
    %cst_64 = arith.constant dense<0.000000e+00> : vector<16x32xf32>
    %197 = tpu.matmul %196, %3, %cst_64 {dimension_numbers = #tpu.dot_dimension_numbers<[1], [0], [0], [1], [0, 0, 1, 1], [], []>} : vector<16x32xbf16>, vector<32x32xbf16>, vector<16x32xf32> -> vector<16x32xf32>
    %198 = vector.broadcast %9 : vector<1x32xf32> to vector<16x32xf32>
    %199 = arith.addf %197, %198 : vector<16x32xf32>
    %200 = vector.extract_strided_slice %183 {offsets = [0, 64], sizes = [16, 32], strides = [1, 1]} : vector<16x96xf32> to vector<16x32xf32>
    %201 = arith.mulf %189, %199 : vector<16x32xf32>
    %202 = arith.addf %200, %201 : vector<16x32xf32>
    %203 = math.tanh %202 : vector<16x32xf32>
    %cst_65 = arith.constant 1.000000e+00 : f32
    %204 = vector.broadcast %cst_65 : f32 to vector<16x32xf32>
    %205 = arith.subf %204, %195 : vector<16x32xf32>
    %206 = arith.mulf %205, %203 : vector<16x32xf32>
    %207 = arith.mulf %195, %140 : vector<16x32xf32>
    %208 = arith.addf %206, %207 : vector<16x32xf32>
    %209 = arith.truncf %208 : vector<16x32xf32> to vector<16x32xbf16>
    %cst_66 = arith.constant dense<0.000000e+00> : vector<16x32xf32>
    %210 = tpu.matmul %209, %4, %cst_66 {dimension_numbers = #tpu.dot_dimension_numbers<[1], [0], [0], [1], [0, 0, 1, 1], [], []>} : vector<16x32xbf16>, vector<32x32xbf16>, vector<16x32xf32> -> vector<16x32xf32>
    %211 = vector.broadcast %10 : vector<1x32xf32> to vector<16x32xf32>
    %212 = arith.addf %210, %211 : vector<16x32xf32>
    %cst_67 = arith.constant 0.000000e+00 : f32
    %213 = vector.broadcast %cst_67 : f32 to vector<16x32xf32>
    %214 = arith.maximumf %212, %213 : vector<16x32xf32>
    %215 = arith.addf %208, %214 : vector<16x32xf32>
    %216 = arith.mulf %215, %163 : vector<16x32xf32>
    %217 = arith.truncf %216 : vector<16x32xf32> to vector<16x32xbf16>
    %cst_68 = arith.constant dense<0.000000e+00> : vector<16x32xf32>
    %218 = tpu.matmul %217, %5, %cst_68 {dimension_numbers = #tpu.dot_dimension_numbers<[1], [0], [0], [1], [0, 0, 1, 1], [], []>} : vector<16x32xbf16>, vector<32x32xbf16>, vector<16x32xf32> -> vector<16x32xf32>
    %219 = vector.broadcast %11 : vector<1x32xf32> to vector<16x32xf32>
    %220 = arith.addf %218, %219 : vector<16x32xf32>
    %c3_69 = arith.constant 3 : index
    %c0_70 = arith.constant 0 : index
    %c0_71 = arith.constant 0 : index
    %221 = vector.load %arg1[%c3_69, %c0_70, %c0_71] : memref<4x16x1xf32, #tpu.memory_space<vmem>>, vector<1x16x1xf32>
    %222 = vector.shape_cast %221 : vector<1x16x1xf32> to vector<16x1xf32>
    %223 = vector.broadcast %222 : vector<16x1xf32> to vector<16x64xf32>
    %224 = arith.mulf %223, %15 : vector<16x64xf32>
    %225 = math.cos %224 : vector<16x64xf32>
    %226 = arith.truncf %225 : vector<16x64xf32> to vector<16x64xbf16>
    %cst_72 = arith.constant dense<0.000000e+00> : vector<16x32xf32>
    %227 = tpu.matmul %226, %1, %cst_72 {dimension_numbers = #tpu.dot_dimension_numbers<[1], [0], [0], [1], [0, 0, 1, 1], [], []>} : vector<16x64xbf16>, vector<64x32xbf16>, vector<16x32xf32> -> vector<16x32xf32>
    %228 = vector.broadcast %7 : vector<1x32xf32> to vector<16x32xf32>
    %229 = arith.addf %227, %228 : vector<16x32xf32>
    %cst_73 = arith.constant 0.000000e+00 : f32
    %230 = vector.broadcast %cst_73 : f32 to vector<16x32xf32>
    %231 = arith.maximumf %229, %230 : vector<16x32xf32>
    %c3_74 = arith.constant 3 : index
    %c0_75 = arith.constant 0 : index
    %c0_76 = arith.constant 0 : index
    %232 = vector.load %arg0[%c3_74, %c0_75, %c0_76] : memref<4x2x16xf32, #tpu.memory_space<vmem>>, vector<1x2x16xf32>
    %233 = vector.shape_cast %232 : vector<1x2x16xf32> to vector<2x16xf32>
    %234 = vector.extract_strided_slice %233 {offsets = [0, 0], sizes = [1, 16], strides = [1, 1]} : vector<2x16xf32> to vector<1x16xf32>
    %235 = vector.shape_cast %234 : vector<1x16xf32> to vector<1x16xf32>
    %236 = vector.broadcast %235 : vector<1x16xf32> to vector<8x16xf32>
    %237 = vector.extract_strided_slice %233 {offsets = [1, 0], sizes = [1, 16], strides = [1, 1]} : vector<2x16xf32> to vector<1x16xf32>
    %238 = vector.shape_cast %237 : vector<1x16xf32> to vector<1x16xf32>
    %239 = vector.broadcast %238 : vector<1x16xf32> to vector<8x16xf32>
    %240 = tpu.concatenate %236, %239 in 0 : vector<8x16xf32>, vector<8x16xf32> -> vector<16x16xf32>
    %241 = arith.truncf %240 : vector<16x16xf32> to vector<16x16xbf16>
    %cst_77 = arith.constant dense<0.000000e+00> : vector<16x64xf32>
    %242 = tpu.matmul %241, %0, %cst_77 {dimension_numbers = #tpu.dot_dimension_numbers<[1], [0], [0], [1], [0, 0, 1, 1], [], []>} : vector<16x16xbf16>, vector<16x64xbf16>, vector<16x64xf32> -> vector<16x64xf32>
    %243 = vector.broadcast %6 : vector<1x64xf32> to vector<16x64xf32>
    %244 = arith.addf %242, %243 : vector<16x64xf32>
    %cst_78 = arith.constant 0.000000e+00 : f32
    %245 = vector.broadcast %cst_78 : f32 to vector<16x64xf32>
    %246 = arith.maximumf %244, %245 : vector<16x64xf32>
    %247 = tpu.concatenate %246, %208 in 1 : vector<16x64xf32>, vector<16x32xf32> -> vector<16x96xf32>
    %248 = arith.truncf %247 : vector<16x96xf32> to vector<16x96xbf16>
    %cst_79 = arith.constant dense<0.000000e+00> : vector<16x96xf32>
    %249 = tpu.matmul %248, %2, %cst_79 {dimension_numbers = #tpu.dot_dimension_numbers<[1], [0], [0], [1], [0, 0, 1, 1], [], []>} : vector<16x96xbf16>, vector<96x96xbf16>, vector<16x96xf32> -> vector<16x96xf32>
    %250 = vector.broadcast %8 : vector<1x96xf32> to vector<16x96xf32>
    %251 = arith.addf %249, %250 : vector<16x96xf32>
    %252 = vector.extract_strided_slice %251 {offsets = [0, 0], sizes = [16, 32], strides = [1, 1]} : vector<16x96xf32> to vector<16x32xf32>
    %253 = arith.negf %252 : vector<16x32xf32>
    %254 = math.exp %253 : vector<16x32xf32>
    %cst_80 = arith.constant 1.000000e+00 : f32
    %255 = vector.broadcast %cst_80 : f32 to vector<16x32xf32>
    %256 = arith.addf %255, %254 : vector<16x32xf32>
    %257 = arith.divf %255, %256 : vector<16x32xf32>
    %258 = vector.extract_strided_slice %251 {offsets = [0, 32], sizes = [16, 32], strides = [1, 1]} : vector<16x96xf32> to vector<16x32xf32>
    %259 = arith.negf %258 : vector<16x32xf32>
    %260 = math.exp %259 : vector<16x32xf32>
    %cst_81 = arith.constant 1.000000e+00 : f32
    %261 = vector.broadcast %cst_81 : f32 to vector<16x32xf32>
    %262 = arith.addf %261, %260 : vector<16x32xf32>
    %263 = arith.divf %261, %262 : vector<16x32xf32>
    %264 = arith.truncf %208 : vector<16x32xf32> to vector<16x32xbf16>
    %cst_82 = arith.constant dense<0.000000e+00> : vector<16x32xf32>
    %265 = tpu.matmul %264, %3, %cst_82 {dimension_numbers = #tpu.dot_dimension_numbers<[1], [0], [0], [1], [0, 0, 1, 1], [], []>} : vector<16x32xbf16>, vector<32x32xbf16>, vector<16x32xf32> -> vector<16x32xf32>
    %266 = vector.broadcast %9 : vector<1x32xf32> to vector<16x32xf32>
    %267 = arith.addf %265, %266 : vector<16x32xf32>
    %268 = vector.extract_strided_slice %251 {offsets = [0, 64], sizes = [16, 32], strides = [1, 1]} : vector<16x96xf32> to vector<16x32xf32>
    %269 = arith.mulf %257, %267 : vector<16x32xf32>
    %270 = arith.addf %268, %269 : vector<16x32xf32>
    %271 = math.tanh %270 : vector<16x32xf32>
    %cst_83 = arith.constant 1.000000e+00 : f32
    %272 = vector.broadcast %cst_83 : f32 to vector<16x32xf32>
    %273 = arith.subf %272, %263 : vector<16x32xf32>
    %274 = arith.mulf %273, %271 : vector<16x32xf32>
    %275 = arith.mulf %263, %208 : vector<16x32xf32>
    %276 = arith.addf %274, %275 : vector<16x32xf32>
    %277 = arith.truncf %276 : vector<16x32xf32> to vector<16x32xbf16>
    %cst_84 = arith.constant dense<0.000000e+00> : vector<16x32xf32>
    %278 = tpu.matmul %277, %4, %cst_84 {dimension_numbers = #tpu.dot_dimension_numbers<[1], [0], [0], [1], [0, 0, 1, 1], [], []>} : vector<16x32xbf16>, vector<32x32xbf16>, vector<16x32xf32> -> vector<16x32xf32>
    %279 = vector.broadcast %10 : vector<1x32xf32> to vector<16x32xf32>
    %280 = arith.addf %278, %279 : vector<16x32xf32>
    %cst_85 = arith.constant 0.000000e+00 : f32
    %281 = vector.broadcast %cst_85 : f32 to vector<16x32xf32>
    %282 = arith.maximumf %280, %281 : vector<16x32xf32>
    %283 = arith.addf %276, %282 : vector<16x32xf32>
    %284 = arith.mulf %283, %231 : vector<16x32xf32>
    %285 = arith.truncf %284 : vector<16x32xf32> to vector<16x32xbf16>
    %cst_86 = arith.constant dense<0.000000e+00> : vector<16x32xf32>
    %286 = tpu.matmul %285, %5, %cst_86 {dimension_numbers = #tpu.dot_dimension_numbers<[1], [0], [0], [1], [0, 0, 1, 1], [], []>} : vector<16x32xbf16>, vector<32x32xbf16>, vector<16x32xf32> -> vector<16x32xf32>
    %287 = vector.broadcast %11 : vector<1x32xf32> to vector<16x32xf32>
    %288 = arith.addf %286, %287 : vector<16x32xf32>
    %289 = tpu.concatenate %84, %152, %220, %288, %276 in 1 : vector<16x32xf32>, vector<16x32xf32>, vector<16x32xf32>, vector<16x32xf32>, vector<16x32xf32> -> vector<16x160xf32>
    %c0_87 = arith.constant 0 : index
    %c0_88 = arith.constant 0 : index
    %290 = vector.load %arg5[%c0_87, %c0_88] : memref<16x160xf32, #tpu.memory_space<vmem>>, vector<16x160xf32>
    tpu.vector_store %arg5[%c0_87, %c0_88], %289 {strides = array<i32>} : memref<16x160xf32, #tpu.memory_space<vmem>>, vector<16x160xf32>,
    return
  }
}

</mosaic_0001>

<bundles_post_ra>
// kernel: iqn_forward.1
= control target key start
LH: loop header
LB: loop body
LE: loop exit
PB: predicated region body
PF: predicated region fallthrough
CT: control target
= control target key end

     0   :  { %10 = vsyncpa [#allocation3], 0  ;;  %s3221_s18 = smov [#allocation2]   ;;  %s4294_s0 = inlined_call_operand.vmem [shape: f32[4,2,16], index: 0, kind: input, shape index: {}]   ;;  %s4295_s1 = inlined_call_operand.vmem [shape: f32[4,16,1], index: 1, kind: input, shape index: {}]   ;;  %s4296_s2 = inlined_call_operand.vmem [shape: f32[16,32], index: 2, kind: input, shape index: {}]   ;;  %s4297_s3 = inlined_call_operand.hbm [shape: bf16[272,128], index: 3, kind: input, shape index: {}]   ;;  %s4298_s4 = inlined_call_operand.vmem [shape: f32[6,128], index: 4, kind: input, shape index: {}]   ;;  %s4299_s5 = inlined_call_operand.vmem [shape: f32[16,160], index: 5, kind: output, shape index: {}]  }
   0x1   :  { %s22_s19 = sshll.u32 %s3221_s18, 4  ;;  %s3197_s22 = scalar_lea.hbm %s4297_s3, 2176  ;;  %s23_s19 = int_to_ptr.vmem [resolvable:$true] %s22_s19 }
   0x2   :  { %p3198_p0 = scmp.ne.s32.totalorder %s4297_s3, %s3197_s22  ;;  %p3201_p1 = scmp.lt.u32.totalorder %s3197_s22, %s4297_s3 }
   0x4   :  { %p3203_p2 = pnand %p3201_p1, %p3198_p0 }
   0x6   :  { %3206 = shalt.err (!%p3203_p2)
}
   0x7   :  { %s3207_s27 = scalar_lea.vmem %s23_s19, 2176  ;;  %p3212_p4 = scmp.lt.s32.totalorder %s23_s19, %s23_s19 }
   0x8   :  { %p3208_p3 = scmp.ne.s32.totalorder %s23_s19, %s3207_s27  ;;  %p3213_p5 = scmp.lt.s32.totalorder %s3207_s27, %s3207_s27 }
   0xa   :  { %p3214_p6 = por %p3213_p5, %p3212_p4 }
   0xc   :  { %p3215_p7 = pnand %p3214_p6, %p3208_p3 }
   0xe   :  { %3218 = shalt.err (!%p3215_p7)
}
   0xf   :  { %s3222_s28 = smov 64   ;;  %s3223_s29 = smov 4  }
  0x10   :  { %28 = dma.hbm_to_vmem [thread:$0]  %s4297_s3, 2176, %s23_s19, [#allocation3], %s3222_s28, %s3222_s28, %s3223_s29  }
  0x11   :  { %3219 = dma.done.wait [#allocation3], 2176  }
  0x12   :  { %3220 = vsyncadd [#allocation3], 4294965120  ;;  %v75_v0 = vlaneseq  ;;  %v3224_v1 = vmov 0   ;;  %v3225_v2 = vmov 0.0   ;;  %vm3226_vm0 = vmmov 0   ;;  %v81_v6 = vld [vmem:[%s4295_s1] sm:$0xff] }
  0x13   :  { %3056 = vset.pattern.permute.xlu0 %v3224_v1  ;;  %2790 = vmatprep.subr.bf16.mxu1 %v3225_v2  ;;  %v3292_v7 = vld [vmem:[#allocation2] sm:$0xff]   ;;  %v82_v8 = vld [vmem:[%s4295_s1 + $0x8] sm:$0xff]  ;;  %vm397_vm1 = vcmask 130048   ;;  %v3326_v18 = vld [vmem:[#allocation2 + $0x10] sm:$0xff]   ;;  %v3227_v51 = vmov 683565275  }
  0x14   :  { %2792 = vmatprep.mubr.msk.bf16.mxu1 %vm3226_vm0, %v3225_v2  ;;  %v379_v3 = vshrl.u32 %v75_v0, 7  ;;  %2778 = vmatprep.subr.bf16.mxu0 %v3225_v2  ;;  %v377_v9 = vld [vmem:[%s4294_s0] sm:$0x3]  ;;  %v3310_v13 = vld [vmem:[%s4296_s2 + $0x8] sm:$0xff]  ;;  %v3328_v19 = vld [vmem:[#allocation2 + $0x30] sm:$0xff]   ;;  %v76_v26 = vand.u32 127, %v75_v0 }
  0x15   :  { %2786 = vmatprep.mubr.msk.bf16.mxu0 %vm3226_vm0, %v3225_v2  ;;  %3062 = vset.pattern.permute.xlu1 %v3224_v1  ;;  %v3305_v12 = vld [vmem:[%s4296_s2] sm:$0xff]  ;;  %v3320_v16 = vld [vmem:[#allocation2 + $0x8] sm:$0xff]   ;;  %v3334_v20 = vld [vmem:[#allocation2 + $0x18] sm:$0xff]   ;;  %v3228_v53 = vmov 2475754826   ;;  %s3233_s21 = smov 96  }
  0x16   :  { %v3285_v4 = vsub.s32 0, %v379_v3  ;;  %v3287_v5 = vsub.s32 1, %v379_v3  ;;  %85 = vperm.xlu0 %3056, %v81_v6   ;;  %2791 = vmatpush3.bf16.msra.mxu1 %v3292_v7  ;;  %v3057_v14 = vpack.i.bf16 %v3310_v13, %v3305_v12  ;;  %v3322_v17 = vld [vmem:[#allocation2 + $0x28] sm:$0xff]   ;;  %v3336_v21 = vld [vmem:[#allocation2 + $0x38] sm:$0xff]   ;;  %v3342_v22 = vld [vmem:[#allocation2 + $0x20] sm:$0xff]   ;;  %v77_v27 = vcvt.s32.f32 %v76_v26  ;;  %s3234_s22 = smov 32  }
  0x17   :  { %2796 = vmatprep.subr.bf16.mxu1 %v3225_v2  ;;  %2779 = vmatpush3.bf16.msra.mxu0 %v3320_v16  ;;  %v3344_v23 = vld [vmem:[#allocation2 + $0x40] sm:$0xff]   ;;  %v3352_v24 = vld [vmem:[#allocation2 + $0x48] sm:$0xff]   ;;  %v3355_v25 = vld [vmem:[#allocation2 + $0x50] sm:$0xff]   ;;  %v3229_v55 = vmov 2131351028  }
  0x18   :  { %v381_v10 = vrot.slane %v377_v9, %v3285_v4  ;;  %v385_v11 = vrot.slane %v377_v9, %v3287_v5  ;;  %3058 = vrot.lane.b32.xlu1 %v3057_v14, %s3222_s28  ;;  %2780 = vmatprep.subr.bf16.mxu0 %v3225_v2  ;;  %v3360_v28 = vmul.f32 3.1415927, %v77_v27  ;;  %v3230_v57 = vmov 2102212464  }
  0x19   :  { %v3231_v59 = vmov 920167782   ;;  %v3232_v6 = vmov 1326507024  }
  0x1a   :  { %v386_v15 = vpack.c.bf16 %v385_v11, %v381_v10  ;;  %90 = vperm.xlu0 %3056, %v82_v8  }
  0x1b   :  { %2781 = vmatpush3.bf16.msra.mxu0 %v3326_v18 }
  0x1c   :  { %2793 = vmatmul.mubr.msk.bf16.vlgmr.msra.gmra.mrb[0].mxu1 %vm397_vm1, %v386_v15  ;;  %2782 = vmatprep.subr.bf16.mxu0 %v3225_v2 }
  0x1d   :  { %2808 = vmatprep.mubr.msk.bf16.mxu1 %vm3226_vm0, %v3225_v2  ;;  %2797 = vmatpush3.bf16.msra.mxu1 %v3322_v17 }
  0x1e   :  { %2798 = vmatprep.subr.bf16.mxu1 %v3225_v2 }
  0x1f   :  { %2783 = vmatpush3.bf16.msra.mxu0 %v3334_v20 }
  0x20   :  { %2784 = vmatprep.subr.bf16.mxu0 %v3225_v2 }
  0x21   :  { %2799 = vmatpush3.bf16.msra.mxu1 %v3328_v19 }
  0x22   :  { %2800 = vmatprep.subr.bf16.mxu1 %v3225_v2 }
  0x23   :  { %2785 = vmatpush3.bf16.msra.mxu0 %v3342_v22 }
  0x24   :  { %2812 = vmatprep.subr.bf16.mxu0 %v3225_v2 }
  0x25   :  { %2801 = vmatpush3.bf16.msra.mxu1 %v3336_v21 }
  0x26   :  { %2802 = vmatprep.subr.bf16.mxu1 %v3225_v2 }
  0x29   :  { %2803 = vmatpush3.bf16.msra.mxu1 %v3344_v23 }
  0x2a   :  { %2804 = vmatprep.subr.bf16.mxu1 %v3225_v2 }
  0x2d   :  { %2805 = vmatpush3.bf16.msra.mxu1 %v3352_v24 }
  0x2e   :  { %2806 = vmatprep.subr.bf16.mxu1 %v3225_v2 }
  0x31   :  { %2807 = vmatpush3.bf16.msra.mxu1 %v3355_v25 }
  0x32   :  { %2828 = vmatprep.subr.bf16.mxu1 %v3225_v2 }
  0x95   :  { %v86_v29 = vpop.permute.xlu0 %85 }
  0x96   :  { %v3363_v30 = vmul.f32 %v86_v29, %v3360_v28 }
  0x98   :  { %v95_v31 = vand.u32 2147483647, %v3363_v30  ;;  %v98_v32 = vand.u32 2139095040, %v3363_v30 }
  0x99   :  { %v91_v33 = vpop.permute.xlu0 %90 }
  0x9a   :  { %v99_v34 = vshrl.u32 %v98_v32, 23  ;;  %v3368_v35 = vmul.f32 %v91_v33, %v3360_v28  ;;  %v102_v36 = vand.u32 8388607, %v95_v31 }
  0x9c   :  { %v2590_v37 = vadd.s32 4294967169, %v99_v34  ;;  %v198_v38 = vand.u32 2147483647, %v3368_v35  ;;  %v201_v39 = vand.u32 2139095040, %v3368_v35  ;;  %v103_v41 = vor.u32 8388608, %v102_v36 }
  0x9e   :  { %v105_v40 = vadd.s32 1, %v2590_v37  ;;  %v202_v42 = vshrl.u32 %v201_v39, 23  ;;  %v205_v45 = vand.u32 8388607, %v198_v38  ;;  %v3376_v48 = vshll.u32 %v103_v41, 8 }
  0xa0   :  { %vm106_vm2 = vcmp.gt.s32.totalorder %v105_v40, 0  ;;  %v2594_v44 = vadd.s32 4294967169, %v202_v42  ;;  %v206_v61 = vor.u32 8388608, %v205_v45 }
  0xa1   :  { %v107_v43 = vsel %vm106_vm2, %v105_v40, 0  ;;  %vm97_vm2 = vcmp.lt.s32.totalorder %v3363_v30, 0 }
  0xa2   :  { %v108_v46 = vshrl.u32 %v107_v43, 5  ;;  %v109_v47 = vand.u32 31, %v107_v43  ;;  %v208_v49 = vadd.s32 1, %v2594_v44 }
  0xa4   :  { %v110_v50 = vsub.s32 32, %v109_v47  ;;  %v112_v52 = vshll.u32 %v3227_v51, %v109_v47  ;;  %v115_v54 = vshll.u32 %v3228_v53, %v109_v47  ;;  %v118_v56 = vshll.u32 %v3229_v55, %v109_v47 }
  0xa5   :  { %v121_v58 = vshll.u32 %v3230_v57, %v109_v47  ;;  %v124_v60 = vshll.u32 %v3231_v59, %v109_v47  ;;  %vm127_vm3 = vcmp.lt.s32.totalorder %v108_v46, 1  ;;  %vm128_vm4 = vcmp.lt.s32.totalorder %v108_v46, 2 }
  0xa6   :  { %v111_v62 = vshrl.u32 %v3227_v51, %v110_v50  ;;  %v113_v63 = vshrl.u32 %v3228_v53, %v110_v50  ;;  %v116_v0 = vshrl.u32 %v3229_v55, %v110_v50  ;;  %v119_v1 = vshrl.u32 %v3230_v57, %v110_v50 }
  0xa7   :  { %v122_v3 = vshrl.u32 %v3231_v59, %v110_v50  ;;  %v125_v8 = vshrl.u32 %v3232_v6, %v110_v50  ;;  %vm130_vm5 = vcmp.lt.s32.totalorder %v108_v46, 4  ;;  %vm209_vm6 = vcmp.gt.s32.totalorder %v208_v49, 0 }
  0xa8   :  { %v114_v9 = vor.u32 %v113_v63, %v112_v52  ;;  %v117_v10 = vor.u32 %v116_v0, %v115_v54  ;;  %v120_v11 = vor.u32 %v119_v1, %v118_v56  ;;  %vm129_vm7 = vcmp.lt.s32.totalorder %v108_v46, 3 }
  0xa9   :  { %v123_v14 = vor.u32 %v122_v3, %v121_v58  ;;  %v126_v15 = vor.u32 %v125_v8, %v124_v60  ;;  %v210_v26 = vsel %vm209_vm6, %v208_v49, 0  ;;  %v246_v47 = vshll.u32 %v206_v61, 8 }
  0xaa   :  { %v131_v27 = vsel %vm127_vm3, %v111_v62, %v114_v9  ;;  %v132_v29 = vsel %vm130_vm5, %v120_v11, 2102212464  ;;  %v135_v32 = vsel %vm127_vm3, %v114_v9, %v117_v10  ;;  %v139_v33 = vsel %vm127_vm3, %v117_v10, %v120_v11 }
  0xab   :  { %v133_v34 = vsel %vm129_vm7, %v117_v10, %v132_v29  ;;  %v136_v36 = vsel %vm130_vm5, %v123_v14, 920167782  ;;  %v140_v37 = vsel %vm130_vm5, %v126_v15, 1326507024  ;;  %v211_v41 = vshrl.u32 %v210_v26, 5 }
  0xac   :  { %v137_v39 = vsel %vm129_vm7, %v120_v11, %v136_v36  ;;  %v141_v40 = vsel %vm129_vm7, %v123_v14, %v140_v37  ;;  %v212_v42 = vand.u32 31, %v210_v26  ;;  %v134_v43 = vsel %vm128_vm4, %v131_v27, %v133_v34 }
  0xad   :  { %v138_v44 = vsel %vm128_vm4, %v135_v32, %v137_v39  ;;  %v142_v45 = vsel %vm128_vm4, %v139_v33, %v141_v40  ;;  %v150_v46 = vmul.u32 %v3376_v48, %v134_v43  ;;  %vm230_vm8 = vcmp.lt.s32.totalorder %v211_v41, 1 }
  0xae   :  { %v3396_v49 = vmul.u32.u64.low %v3376_v48, %v142_v45  ;;  %v3397_v50 = vmul.u32.u64.high %v3376_v48, %v142_v45, %v3396_v49  ;;  %v3400_v52 = vmul.u32.u64.low %v3376_v48, %v138_v44  ;;  %v3401_v54 = vmul.u32.u64.high %v3376_v48, %v138_v44, %v3400_v52 }
  0xaf   :  { %v213_v56 = vsub.s32 32, %v212_v42  ;;  %v215_v58 = vshll.u32 %v3227_v51, %v212_v42  ;;  %v218_v60 = vshll.u32 %v3228_v53, %v212_v42  ;;  %v221_v62 = vshll.u32 %v3229_v55, %v212_v42 }
  0xb0   :  { %v224_v61 = vshll.u32 %v3230_v57, %v212_v42  ;;  %v227_v63 = vshll.u32 %v3231_v59, %v212_v42  ;;  %vm152_vm9 = vc.u32 %v3397_v50, %v3400_v52  ;;  %v153_v9 = vadd.s32 1, %v3401_v54 }
  0xb1   :  { %v214_v0 = vshrl.u32 %v3227_v51, %v213_v56  ;;  %v216_v1 = vshrl.u32 %v3228_v53, %v213_v56  ;;  %v219_v3 = vshrl.u32 %v3229_v55, %v213_v56  ;;  %v222_v8 = vshrl.u32 %v3230_v57, %v213_v56 }
  0xb2   :  { %v225_v48 = vshrl.u32 %v3231_v59, %v213_v56  ;;  %vm231_vm10 = vcmp.lt.s32.totalorder %v211_v41, 2  ;;  %v228_v15 = vshrl.u32 %v3232_v6, %v213_v56  ;;  %v154_v26 = vsel %vm152_vm9, %v153_v9, %v3401_v54 }
  0xb3   :  { %v217_v10 = vor.u32 %v216_v1, %v215_v58  ;;  %v220_v11 = vor.u32 %v219_v3, %v218_v60  ;;  %v223_v14 = vor.u32 %v222_v8, %v221_v62  ;;  %vm232_vm11 = vcmp.lt.s32.totalorder %v211_v41, 3 }
  0xb4   :  { %v226_v27 = vor.u32 %v225_v48, %v224_v61  ;;  %vm233_vm12 = vcmp.lt.s32.totalorder %v211_v41, 4  ;;  %v155_v29 = vadd.s32 %v154_v26, %v150_v46  ;;  %v229_v32 = vor.u32 %v228_v15, %v227_v63 }
  0xb5   :  { %v234_v33 = vsel %vm230_vm8, %v214_v0, %v217_v10  ;;  %v235_v34 = vsel %vm233_vm12, %v223_v14, 2102212464  ;;  %v238_v37 = vsel %vm230_vm8, %v217_v10, %v220_v11  ;;  %v242_v40 = vsel %vm230_vm8, %v220_v11, %v223_v14 }
  0xb6   :  { %v236_v36 = vsel %vm232_vm11, %v220_v11, %v235_v34  ;;  %v239_v39 = vsel %vm233_vm12, %v226_v27, 920167782  ;;  %v156_v42 = vadd.s32 536870912, %v155_v29  ;;  %v243_v44 = vsel %vm233_vm12, %v229_v32, 1326507024 }
  0xb7   :  { %v240_v43 = vsel %vm232_vm11, %v223_v14, %v239_v39  ;;  %v237_v45 = vsel %vm231_vm10, %v234_v33, %v236_v36  ;;  %v244_v54 = vsel %vm232_vm11, %v226_v27, %v243_v44  ;;  %vm3446_vm3 = vcmp.le.f32.partialorder %v95_v31, 0.7853982 }
  0xb8   :  { %v241_v49 = vsel %vm231_vm10, %v238_v37, %v240_v43  ;;  %v3425_v56 = vshrl.u32 %v156_v42, 30  ;;  %v245_v58 = vsel %vm231_vm10, %v242_v40, %v244_v54  ;;  %v253_v0 = vmul.u32 %v246_v47, %v237_v45 }
  0xb9   :  { %v3428_v60 = vmul.u32.u64.low %v246_v47, %v241_v49  ;;  %v3429_v62 = vmul.u32.u64.high %v246_v47, %v241_v49, %v3428_v60  ;;  %v3431_v46 = vmul.u32.u64.low %v246_v47, %v245_v58  ;;  %v3432_v61 = vmul.u32.u64.high %v246_v47, %v245_v58, %v3431_v46 }
  0xba   :  { %v158_v63 = vshll.u32 %v3425_v56, 30  ;;  %v151_v47 = vadd.s32 %v3400_v52, %v3397_v50  ;;  %vm200_vm4 = vcmp.lt.s32.totalorder %v3368_v35, 0  ;;  %vm199_vm5 = vcmp.le.f32.partialorder %v198_v38, 0.7853982 }
  0xbb   :  { %v256_v3 = vadd.s32 1, %v3429_v62  ;;  %vm255_vm13 = vc.u32 %v3432_v61, %v3428_v60  ;;  %vm187_vm12 = vweird.f32 %v3363_v30 }
  0xbc   :  { %v159_v1 = vsub.s32 %v155_v29, %v158_v63  ;;  %v254_v63 = vadd.s32 %v3428_v60, %v3432_v61 }
  0xbd   :  { %v257_v9 = vsel %vm255_vm13, %v256_v3, %v3429_v62  ;;  %vm290_vm13 = vweird.f32 %v3368_v35 }
  0xbe   :  { %v161_v8 = vsub.s32 0, %v159_v1  ;;  %v258_v48 = vadd.s32 %v257_v9, %v253_v0 }
  0xc0   :  { %v2591_v41 = vmin.u32 %v161_v8, %v159_v1  ;;  %v259_v10 = vadd.s32 536870912, %v258_v48 }
  0xc2   :  { %v163_v11 = vclz %v2591_v41  ;;  %v260_v14 = vshrl.u32 %v259_v10, 30 }
  0xc4   :  { %v2592_v15 = vadd.s32 4294967294, %v163_v11  ;;  %v261_v26 = vshll.u32 %v260_v14, 30 }
  0xc6   :  { %vm2593_vm14 = vcmp.lt.s32.totalorder %v2592_v15, 0  ;;  %v262_v32 = vsub.s32 %v258_v48, %v261_v26 }
  0xc7   :  { %v166_v27 = vsel %vm2593_vm14, 0, %v2592_v15  ;;  %vm330_vm14 = vcmask 523264  }
  0xc8   :  { %v167_v29 = vsub.s32 32, %v166_v27  ;;  %v171_v33 = vsub.s32 4294967266, %v166_v27  ;;  %v264_v34 = vsub.s32 0, %v262_v32  ;;  %v168_v36 = vshll.u32 %v159_v1, %v166_v27 }
  0xc9   :  { %v181_v27 = vsub.s32 4, %v3425_v56 }
  0xca   :  { %v169_v37 = vshrl.u32 %v151_v47, %v167_v29  ;;  %v172_v39 = vadd.s32 127, %v171_v33  ;;  %v2595_v40 = vmin.u32 %v264_v34, %v262_v32  ;;  %v284_v47 = vsub.s32 4, %v260_v14 }
  0xcb   :  { %v182_v29 = vsel %vm97_vm2, %v181_v27, %v3425_v56  ;;  %v3059_v56 = vpop.permute.xlu1 %3058  ;;  %v3472_v27 = vld [vmem:[#allocation2 + $0x58] sm:$0xff]  }
  0xcc   :  { %v170_v42 = vor.u32 %v169_v37, %v168_v36  ;;  %v173_v43 = vshll.u32 %v172_v39, 23  ;;  %v266_v44 = vclz %v2595_v40  ;;  %v184_v36 = vsel %vm3446_vm3, 0, %v182_v29 }
  0xcd   :  { %v285_v37 = vsel %vm200_vm4, %v284_v47, %v260_v14 }
  0xce   :  { %v174_v45 = vor.u32 4788187, %v173_v43  ;;  %v2596_v49 = vadd.s32 4294967294, %v266_v44  ;;  %v177_v58 = vcvt.s32.f32 %v170_v42  ;;  %v287_v40 = vsel %vm199_vm5, 0, %v285_v37 }
  0xcf   :  { %v188_v42 = vand.u32 3, %v184_v36  ;;  %v291_v44 = vand.u32 3, %v287_v40 }
  0xd0   :  { %v175_v54 = vand.u32 2147483647, %v174_v45  ;;  %vm2597_vm15 = vcmp.lt.s32.totalorder %v2596_v49, 0  ;;  %v3466_v45 = vld [vmem:[%s4298_s4] ss:$0 sm:$0xff] }
  0xd1   :  { %v269_v46 = vsel %vm2597_vm15, 0, %v2596_v49  ;;  %vm190_vm6 = vcmp.eq.s32.totalorder %v188_v42, 0  ;;  %vm193_vm7 = vcmp.eq.s32.totalorder %v188_v42, 2  ;;  %vm189_vm8 = vcmp.lt.s32.totalorder %v188_v42, 2 }
  0xd2   :  { %v178_v62 = vmul.f32 %v177_v58, %v175_v54  ;;  %v270_v50 = vsub.s32 32, %v269_v46  ;;  %v274_v52 = vsub.s32 4294967266, %v269_v46  ;;  %v271_v1 = vshll.u32 %v262_v32, %v269_v46 }
  0xd3   :  { %vm293_vm9 = vcmp.eq.s32.totalorder %v291_v44, 0  ;;  %vm296_vm10 = vcmp.eq.s32.totalorder %v291_v44, 2  ;;  %vm292_vm11 = vcmp.lt.s32.totalorder %v291_v44, 2  ;;  %vm495_vm15 = vcmask 785408  }
  0xd4   :  { %v179_v0 = vxor.u32 2147483648, %v178_v62  ;;  %v272_v3 = vshrl.u32 %v254_v63, %v270_v50  ;;  %v275_v8 = vadd.s32 127, %v274_v52  ;;  %v3061_v52 = vunpack.i.h.bf16 %v3059_v56 }
  0xd6   :  { %v180_v9 = vsel %vm97_vm2, %v179_v0, %v178_v62  ;;  %v273_v41 = vor.u32 %v272_v3, %v271_v1  ;;  %v276_v10 = vshll.u32 %v275_v8, 23  ;;  %v3060_v0 = vunpack.i.l.bf16 %v3059_v56 }
  0xd7   :  { %v183_v60 = vsel %vm3446_vm3, %v3363_v30, %v180_v9  ;;  %v3479_v30 = vld [vmem:[#allocation2 + $0x60] sm:$0xff]   ;;  %vm569_vm2 = vcmask 261120  }
  0xd8   :  { %v277_v61 = vor.u32 4788187, %v276_v10  ;;  %3095 = vcosq.f32 %v183_v60  ;;  %v280_v15 = vcvt.s32.f32 %v273_v41 }
  0xd9   :  { %3097 = vsinq.f32 %v183_v60 }
  0xda   :  { %v278_v11 = vand.u32 2147483647, %v277_v61 }
  0xdc   :  { %v281_v26 = vmul.f32 %v280_v15, %v278_v11 }
  0xde   :  { %v282_v32 = vxor.u32 2147483648, %v281_v26 }
  0xe0   :  { %v283_v31 = vsel %vm200_vm4, %v282_v32, %v281_v26 }
  0xe1   :  { %v286_v33 = vsel %vm199_vm5, %v3368_v35, %v283_v31  ;;  %v552_v35 = vpack.c.bf16 %v3310_v13, %v3305_v12 }
  0xe2   :  { %3099 = vcosq.f32 %v286_v33  ;;  %v3096_v34 = vpop.eup %3095 }
  0xe3   :  { %3101 = vsinq.f32 %v286_v33  ;;  %v3098_v39 = vpop.eup %3097  ;;  %v194_v38 = vxor.u32 2147483648, %v3096_v34  ;;  %v3496_v33 = vld [vmem:[%s4298_s4 + $0x2] ss:$0 sm:$0xff] }
  0xe4   :  { %v191_v43 = vxor.u32 2147483648, %v3098_v39 }
  0xe5   :  { %v195_v58 = vsel %vm193_vm7, %v194_v38, %v3098_v39 }
  0xe6   :  { %v192_v54 = vsel %vm190_vm6, %v3096_v34, %v191_v43 }
  0xe7   :  { %v196_v8 = vsel %vm189_vm8, %v192_v54, %v195_v58 }
  0xe8   :  { %v197_v15 = vsel %vm187_vm12, nan, %v196_v8 }
  0xec   :  { %v3100_v49 = vpop.eup %3099 }
  0xed   :  { %v3102_v46 = vpop.eup %3101  ;;  %v297_v14 = vxor.u32 2147483648, %v3100_v49 }
  0xee   :  { %v294_v1 = vxor.u32 2147483648, %v3102_v46 }
  0xef   :  { %v435_v62 = vpop.f32.mrb[0].mxu1  ;;  %v298_v9 = vsel %vm296_vm10, %v297_v14, %v3102_v46 }
  0xf0   :  { %v436_v63 = vadd.f32 %v3466_v45, %v435_v62  ;;  %v2794_v50 = vpop.f32.mrb[1].mxu1  ;;  %v295_v60 = vsel %vm293_vm9, %v3100_v49, %v294_v1  ;;  %v3507_v1 = vld [vmem:[%s4298_s4 + $0x3] ss:$0 sm:$0xff] }
  0xf1   :  { %v438_v3 = vpop.f32.mrb[2].mxu1  ;;  %v299_v61 = vsel %vm292_vm11, %v295_v60, %v298_v9 }
  0xf2   :  { %v442_v48 = vmax.f32 %v436_v63, 0.0  ;;  %v439_v41 = vadd.f32 %v3466_v45, %v438_v3  ;;  %v2795_v10 = vpop.f32.mrb[3].mxu1  ;;  %v300_v26 = vsel %vm290_vm13, nan, %v299_v61 }
  0xf3   :  { %v301_v32 = vpack.c.bf16 %v300_v26, %v197_v15 }
  0xf4   :  { %v443_v11 = vmax.f32 %v439_v41, 0.0  ;;  %v452_v31 = vsel %vm330_vm14, %v442_v48, %v3060_v0 }
  0xf5   :  { %2787 = vmatmul.mubr.msk.bf16.vlgmr.msra.gmra.mrb[0].mxu0 %vm330_vm14, %v301_v32  ;;  %v3513_v32 = vld [vmem:[#allocation2 + $0x68] sm:$0xff]  }
  0xf6   :  { %v453_v47 = vsel %vm330_vm14, %v443_v11, %v3061_v52  ;;  %2813 = vmatpush3.bf16.msra.mxu0 %v3472_v27  ;;  %2816 = vmatprep.mubr.msk.bf16.mxu0 %vm3226_vm0, %v3225_v2 }
  0xf7   :  { %v454_v29 = vpack.c.bf16 %v453_v47, %v452_v31  ;;  %2814 = vmatprep.subr.bf16.mxu0 %v3225_v2  ;;  %v3517_v47 = vld [vmem:[#allocation2 + $0x70] sm:$0xff]  }
  0xf9   :  { %2809 = vmatmul.mubr.msk.bf16.vlgmr.msra.gmra.mrb[4].mxu1 %vm495_vm15, %v454_v29 }
  0xfa   :  { %2832 = vmatprep.mubr.msk.bf16.mxu1 %vm3226_vm0, %v3225_v2  ;;  %2815 = vmatpush3.bf16.msra.mxu0 %v3479_v30 }
  0xfb   :  { %2820 = vmatprep.subr.bf16.mxu0 %v3225_v2 }
  0xfd   :  { %2817 = vmatmul.mubr.msk.bf16.vlgmr.msra.gmra.mrb[4].mxu0 %vm569_vm2, %v552_v35 }
  0xfe   :  { %2824 = vmatprep.mubr.msk.bf16.mxu0 %vm3226_vm0, %v3225_v2  ;;  %2821 = vmatpush3.bf16.msra.mxu0 %v3513_v32 }
  0xff   :  { %2822 = vmatprep.subr.bf16.mxu0 %v3225_v2 }
 0x102   :  { %2823 = vmatpush3.bf16.msra.mxu0 %v3517_v47 }
 0x103   :  { %2836 = vmatprep.subr.bf16.mxu0 %v3225_v2 }
 0x1c8   :  { %v3498_v34 = vpop.f32.mrb[0].mxu0 }
 0x1c9   :  { %v2788_v36 = vpop.f32.mrb[1].mxu0 }
 0x1ca   :  { %v3500_v39 = vpop.f32.mrb[2].mxu0 }
 0x1cb   :  { %v2789_v43 = vpop.f32.mrb[3].mxu0 }
 0x1cc   :  { %v533_v37 = vpop.f32.mrb[4].mxu1 }
 0x1cd   :  { %v534_v40 = vadd.f32 %v3496_v33, %v533_v37  ;;  %v2810_v42 = vpop.f32.mrb[5].mxu1 }
 0x1ce   :  { %v536_v38 = vpop.f32.mrb[6].mxu1 }
 0x1cf   :  { %v2615_v44 = vmul.f32 -1.442695, %v534_v40  ;;  %v537_v56 = vadd.f32 %v3496_v33, %v536_v38  ;;  %v2811_v49 = vpop.f32.mrb[7].mxu1 }
 0x1d0   :  { %v607_v58 = vpop.f32.mrb[4].mxu0 }
 0x1d1   :  { %3103 = vpow2.f32 %v2615_v44  ;;  %v2616_v54 = vmul.f32 -1.442695, %v537_v56  ;;  %v2818_v62 = vpop.f32.mrb[5].mxu0  ;;  %v608_v3 = vadd.f32 %v3507_v1, %v607_v58  ;;  %v3556_v58 = vld [vmem:[%s4298_s4 + $0x1] ss:$0 sm:$0xff] }
 0x1d2   :  { %v610_v46 = vpop.f32.mrb[6].mxu0 }
 0x1d3   :  { %3105 = vpow2.f32 %v2616_v54  ;;  %v2819_v14 = vpop.f32.mrb[7].mxu0  ;;  %v611_v9 = vadd.f32 %v3507_v1, %v610_v46 }
 0x1db   :  { %v3104_v63 = vpop.eup %3103 }
 0x1dc   :  { %v546_v50 = vadd.f32 1.0, %v3104_v63 }
 0x1dd   :  { %v3106_v52 = vpop.eup %3105 }
 0x1de   :  { %3107 = vrcp.f32 %v546_v50  ;;  %v547_v0 = vadd.f32 1.0, %v3106_v52  ;;  %v372_v52 = vadd.f32 %v3556_v58, %v3500_v39  ;;  %v3574_v39 = vld [vmem:[#allocation2 + $0x78] sm:$0xff]  }
 0x1df   :  { %2829 = vmatpush3.bf16.msra.mxu1 %v3574_v39 }
 0x1e0   :  { %3109 = vrcp.f32 %v547_v0  ;;  %2830 = vmatprep.subr.bf16.mxu1 %v3225_v2 }
 0x1e8   :  { %v3108_v8 = vpop.eup %3107 }
 0x1e9   :  { %v614_v48 = vmul.f32 %v3108_v8, %v608_v3  ;;  %v628_v37 = vsub.f32 1.0, %v3108_v8 }
 0x1ea   :  { %v3110_v41 = vpop.eup %3109 }
 0x1eb   :  { %618 = vrot.lane.b32.xlu1 %v614_v48, %s3222_s28  ;;  %v615_v10 = vmul.f32 %v3110_v41, %v611_v9  ;;  %v3577_v48 = vld [vmem:[#allocation2 + $0x80] sm:$0xff]  }
 0x1ec   :  { %2831 = vmatpush3.bf16.msra.mxu1 %v3577_v48 }
 0x1ed   :  { %620 = vrot.lane.b32.xlu0 %v615_v10, %s3222_s28  ;;  %2848 = vmatprep.subr.bf16.mxu1 %v3225_v2 }
 0x25d   :  { %v619_v60 = vpop.permute.xlu1 %618 }
 0x25e   :  { %v624_v61 = vadd.f32 %v619_v60, %v534_v40  ;;  %v629_v40 = vsub.f32 1.0, %v3110_v41 }
 0x25f   :  { %v621_v11 = vpop.permute.xlu0 %620 }
 0x260   :  { %3111 = vtanh.f32 %v624_v61  ;;  %v625_v15 = vadd.f32 %v621_v11, %v537_v56 }
 0x262   :  { %3113 = vtanh.f32 %v625_v15 }
 0x26a   :  { %v3112_v26 = vpop.eup %3111 }
 0x26b   :  { %632 = vrot.lane.b32.xlu1 %v3112_v26, %s3233_s21 }
 0x26c   :  { %v3114_v31 = vpop.eup %3113 }
 0x26d   :  { %634 = vrot.lane.b32.xlu0 %v3114_v31, %s3233_s21 }
 0x26f   :  { %640 = vrot.lane.b32.xlu1 %v3305_v12, %s3234_s22 }
 0x271   :  { %642 = vrot.lane.b32.xlu0 %v3310_v13, %s3234_s22 }
 0x2dd   :  { %v633_v29 = vpop.permute.xlu1 %632 }
 0x2de   :  { %v638_v38 = vmul.f32 %v633_v29, %v628_v37 }
 0x2df   :  { %v635_v35 = vpop.permute.xlu0 %634 }
 0x2e0   :  { %v639_v44 = vmul.f32 %v635_v35, %v629_v40  ;;  %v2630_v35 = vld [vmem:[%s4295_s1 + $0x18] sm:$0xff] }
 0x2e1   :  { %v641_v36 = vpop.permute.xlu1 %640 }
 0x2e2   :  { %v646_v42 = vmul.f32 %v3108_v8, %v641_v36  ;;  %v376_v8 = vmax.f32 %v372_v52, 0.0 }
 0x2e3   :  { %v643_v43 = vpop.permute.xlu0 %642 }
 0x2e4   :  { %v647_v56 = vmul.f32 %v3110_v41, %v643_v43  ;;  %v3527_v49 = vadd.f32 %v646_v42, %v638_v38 }
 0x2e6   :  { %v3529_v12 = vadd.f32 %v647_v56, %v639_v44 }
 0x2e8   :  { %v650_v54 = vpack.c.bf16 %v3529_v12, %v3527_v49  ;;  %v3063_v9 = vpack.i.bf16 %v3529_v12, %v3527_v49 }
 0x2ea   :  { %656 = vrot.lane.b32.xlu1 %v650_v54, %s3233_s21 }
 0x35c   :  { %v3534_v13 = vpop.permute.xlu1 %656 }
 0x35d   :  { %2825 = vmatmul.mubr.msk.bf16.vlgmr.msra.gmra.mrb[8].mxu0 %vm569_vm2, %v3534_v13 }
 0x35e   :  { %2837 = vmatpush3.bf16.msra.mxu0 %v3320_v16  ;;  %2844 = vmatprep.mubr.msk.bf16.mxu0 %vm3226_vm0, %v3225_v2  ;;  %v3551_v16 = vld [vmem:[%s4298_s4 + $0x4] ss:$0 sm:$0xff] }
 0x35f   :  { %2838 = vmatprep.subr.bf16.mxu0 %v3225_v2 }
 0x362   :  { %2839 = vmatpush3.bf16.msra.mxu0 %v3326_v18 }
 0x363   :  { %2840 = vmatprep.subr.bf16.mxu0 %v3225_v2 }
 0x366   :  { %2841 = vmatpush3.bf16.msra.mxu0 %v3334_v20 }
 0x367   :  { %2842 = vmatprep.subr.bf16.mxu0 %v3225_v2 }
 0x36a   :  { %2843 = vmatpush3.bf16.msra.mxu0 %v3342_v22  ;;  %v369_v22 = vadd.f32 %v3556_v58, %v3498_v34  ;;  %v2629_v34 = vld [vmem:[%s4295_s1 + $0x10] sm:$0xff] }
 0x36b   :  { %2870 = vmatprep.subr.bf16.mxu0 %v3225_v2 }
 0x36c   :  { %v375_v3 = vmax.f32 %v369_v22, 0.0 }
 0x430   :  { %v707_v18 = vpop.f32.mrb[8].mxu0 }
 0x431   :  { %v708_v62 = vadd.f32 %v3551_v16, %v707_v18  ;;  %v2826_v20 = vpop.f32.mrb[9].mxu0 }
 0x432   :  { %v710_v46 = vpop.f32.mrb[10].mxu0 }
 0x433   :  { %v714_v14 = vmax.f32 %v708_v62, 0.0  ;;  %v711_v63 = vadd.f32 %v3551_v16, %v710_v46  ;;  %v2827_v50 = vpop.f32.mrb[11].mxu0 }
 0x435   :  { %v715_v0 = vmax.f32 %v711_v63, 0.0  ;;  %718 = vrot.lane.b32.xlu0 %v714_v14, %s3234_s22 }
 0x437   :  { %720 = vrot.lane.b32.xlu1 %v715_v0, %s3234_s22 }
 0x439   :  { %728 = vrot.lane.b32.xlu0 %v375_v3, %s3234_s22 }
 0x43b   :  { %730 = vrot.lane.b32.xlu1 %v376_v8, %s3234_s22 }
 0x43f   :  { %805 = vperm.xlu1 %3062, %v2629_v34  }
 0x443   :  { %3064 = vrot.lane.b32.xlu1 %v3063_v9, %s3234_s22 }
 0x4a7   :  { %v719_v41 = vpop.permute.xlu0 %718 }
 0x4a8   :  { %v724_v61 = vadd.f32 %v719_v41, %v3527_v49 }
 0x4a9   :  { %v721_v10 = vpop.permute.xlu1 %720 }
 0x4aa   :  { %v725_v11 = vadd.f32 %v721_v10, %v3529_v12 }
 0x4ab   :  { %v729_v60 = vpop.permute.xlu0 %728 }
 0x4ac   :  { %v734_v26 = vmul.f32 %v729_v60, %v724_v61 }
 0x4ad   :  { %v731_v15 = vpop.permute.xlu1 %730 }
 0x4ae   :  { %v735_v31 = vmul.f32 %v731_v15, %v725_v11 }
 0x4b0   :  { %v736_v29 = vpack.c.bf16 %v735_v31, %v734_v26 }
 0x4b2   :  { %742 = vrot.lane.b32.xlu0 %v736_v29, %s3233_s21 }
 0x4b6   :  { %810 = vperm.xlu0 %3056, %v2630_v35  }
 0x4be   :  { %v806_v36 = vpop.permute.xlu1 %805 }
 0x4bf   :  { %v3589_v37 = vmul.f32 %v806_v36, %v3360_v28 }
 0x4c1   :  { %v818_v40 = vand.u32 2139095040, %v3589_v37  ;;  %v815_v20 = vand.u32 2147483647, %v3589_v37 }
 0x4c3   :  { %v819_v42 = vshrl.u32 %v818_v40, 23  ;;  %v822_v9 = vand.u32 8388607, %v815_v20 }
 0x4c5   :  { %v2631_v43 = vadd.s32 4294967169, %v819_v42  ;;  %v823_v15 = vor.u32 8388608, %v822_v9 }
 0x4c7   :  { %v825_v38 = vadd.s32 1, %v2631_v43  ;;  %v863_v40 = vshll.u32 %v823_v15, 8 }
 0x4c9   :  { %vm826_vm3 = vcmp.gt.s32.totalorder %v825_v38, 0 }
 0x4ca   :  { %v827_v44 = vsel %vm826_vm3, %v825_v38, 0 }
 0x4cb   :  { %v829_v56 = vand.u32 31, %v827_v44  ;;  %v828_v46 = vshrl.u32 %v827_v44, 5 }
 0x4cd   :  { %v830_v54 = vsub.s32 32, %v829_v56  ;;  %v841_v18 = vshll.u32 %v3230_v57, %v829_v56  ;;  %v844_v22 = vshll.u32 %v3231_v59, %v829_v56  ;;  %v832_v63 = vshll.u32 %v3227_v51, %v829_v56 }
 0x4ce   :  { %v835_v50 = vshll.u32 %v3228_v53, %v829_v56  ;;  %v838_v3 = vshll.u32 %v3229_v55, %v829_v56  ;;  %vm850_vm4 = vcmp.lt.s32.totalorder %v828_v46, 4  ;;  %vm847_vm5 = vcmp.lt.s32.totalorder %v828_v46, 1 }
 0x4cf   :  { %v842_v62 = vshrl.u32 %v3231_v59, %v830_v54  ;;  %v845_v14 = vshrl.u32 %v3232_v6, %v830_v54  ;;  %v833_v52 = vshrl.u32 %v3228_v53, %v830_v54  ;;  %v836_v0 = vshrl.u32 %v3229_v55, %v830_v54 }
 0x4d0   :  { %v839_v8 = vshrl.u32 %v3230_v57, %v830_v54  ;;  %vm849_vm6 = vcmp.lt.s32.totalorder %v828_v46, 3  ;;  %vm848_vm7 = vcmp.lt.s32.totalorder %v828_v46, 2  ;;  %v831_v56 = vshrl.u32 %v3227_v51, %v830_v54 }
 0x4d1   :  { %v843_v34 = vor.u32 %v842_v62, %v841_v18  ;;  %v846_v41 = vor.u32 %v845_v14, %v844_v22  ;;  %v834_v10 = vor.u32 %v833_v52, %v832_v63  ;;  %v837_v60 = vor.u32 %v836_v0, %v835_v50 }
 0x4d2   :  { %v840_v61 = vor.u32 %v839_v8, %v838_v3 }
 0x4d3   :  { %v856_v11 = vsel %vm850_vm4, %v843_v34, 920167782  ;;  %v860_v26 = vsel %vm850_vm4, %v846_v41, 1326507024  ;;  %v855_v31 = vsel %vm847_vm5, %v834_v10, %v837_v60  ;;  %v851_v14 = vsel %vm847_vm5, %v831_v56, %v834_v10 }
 0x4d4   :  { %v857_v29 = vsel %vm849_vm6, %v840_v61, %v856_v11  ;;  %v859_v35 = vsel %vm847_vm5, %v837_v60, %v840_v61  ;;  %v861_v36 = vsel %vm849_vm6, %v843_v34, %v860_v26  ;;  %v852_v22 = vsel %vm850_vm4, %v840_v61, 2102212464  ;;  %v2640_v34 = vld [vmem:[%s4294_s0 + $0x2] sm:$0x3] }
 0x4d5   :  { %v858_v42 = vsel %vm848_vm7, %v855_v31, %v857_v29  ;;  %v862_v43 = vsel %vm848_vm7, %v859_v35, %v861_v36  ;;  %v853_v63 = vsel %vm849_vm6, %v837_v60, %v852_v22  ;;  %v1073_v46 = vrot.slane %v2640_v34, %v3285_v4 }
 0x4d6   :  { %v3613_v38 = vmul.u32.u64.low %v863_v40, %v858_v42  ;;  %v3614_v44 = vmul.u32.u64.high %v863_v40, %v858_v42, %v3613_v38  ;;  %v3618_v18 = vmul.u32.u64.low %v863_v40, %v862_v43  ;;  %v3619_v62 = vmul.u32.u64.high %v863_v40, %v862_v43, %v3618_v18 }
 0x4d7   :  { %v854_v50 = vsel %vm848_vm7, %v851_v14, %v853_v63  ;;  %v1077_v41 = vrot.slane %v2640_v34, %v3287_v5  ;;  %vm817_vm5 = vcmp.lt.s32.totalorder %v3589_v37, 0  ;;  %vm3694_vm7 = vcmp.le.f32.partialorder %v815_v20, 0.7853982 }
 0x4d8   :  { %v873_v52 = vadd.s32 1, %v3614_v44  ;;  %vm872_vm8 = vc.u32 %v3619_v62, %v3613_v38  ;;  %v870_v0 = vmul.u32 %v863_v40, %v854_v50 }
 0x4d9   :  { %v1078_v60 = vpack.c.bf16 %v1077_v41, %v1073_v46 }
 0x4da   :  { %v874_v3 = vsel %vm872_vm8, %v873_v52, %v3614_v44 }
 0x4db   :  { %v875_v54 = vadd.s32 %v874_v3, %v870_v0 }
 0x4dd   :  { %v876_v8 = vadd.s32 536870912, %v875_v54 }
 0x4df   :  { %v3635_v10 = vshrl.u32 %v876_v8, 30 }
 0x4e1   :  { %v878_v61 = vshll.u32 %v3635_v10, 30 }
 0x4e3   :  { %v3643_v11 = vsub.s32 %v875_v54, %v878_v61 }
 0x524   :  { %v743_v9 = vpop.permute.xlu0 %742 }
 0x525   :  { %2833 = vmatmul.mubr.msk.bf16.vlgmr.msra.gmra.mrb[8].mxu1 %vm569_vm2, %v743_v9 }
 0x526   :  { %2849 = vmatpush3.bf16.msra.mxu1 %v3292_v7  ;;  %2850 = vmatprep.mubr.msk.bf16.mxu1 %vm3226_vm0, %v3225_v2  ;;  %v881_v7 = vsub.s32 0, %v3643_v11 }
 0x527   :  { %2854 = vmatprep.subr.bf16.mxu1 %v3225_v2 }
 0x528   :  { %v2632_v26 = vmin.u32 %v881_v7, %v3643_v11 }
 0x52a   :  { %v883_v29 = vclz %v2632_v26 }
 0x52c   :  { %v2633_v36 = vadd.s32 4294967294, %v883_v29 }
 0x52d   :  { %2851 = vmatmul.mubr.msk.bf16.vlgmr.msra.gmra.mrb[12].mxu1 %vm397_vm1, %v1078_v60 }
 0x52e   :  { %2855 = vmatpush3.bf16.msra.mxu1 %v3322_v17  ;;  %2866 = vmatprep.mubr.msk.bf16.mxu1 %vm3226_vm0, %v3225_v2  ;;  %vm2634_vm10 = vcmp.lt.s32.totalorder %v2633_v36, 0 }
 0x52f   :  { %2856 = vmatprep.subr.bf16.mxu1 %v3225_v2  ;;  %v886_v56 = vsel %vm2634_vm10, 0, %v2633_v36 }
 0x530   :  { %v891_v61 = vsub.s32 4294967266, %v886_v56 }
 0x532   :  { %2857 = vmatpush3.bf16.msra.mxu1 %v3328_v19 }
 0x533   :  { %2858 = vmatprep.subr.bf16.mxu1 %v3225_v2 }
 0x535   :  { %v811_v15 = vpop.permute.xlu0 %810 }
 0x536   :  { %v3654_v31 = vmul.f32 %v811_v15, %v3360_v28  ;;  %2859 = vmatpush3.bf16.msra.mxu1 %v3336_v21 }
 0x537   :  { %2860 = vmatprep.subr.bf16.mxu1 %v3225_v2 }
 0x538   :  { %v921_v17 = vand.u32 2139095040, %v3654_v31  ;;  %v918_v42 = vand.u32 2147483647, %v3654_v31  ;;  %vm920_vm8 = vcmp.lt.s32.totalorder %v3654_v31, 0 }
 0x53a   :  { %v922_v35 = vshrl.u32 %v921_v17, 23  ;;  %2861 = vmatpush3.bf16.msra.mxu1 %v3344_v23  ;;  %v925_v23 = vand.u32 8388607, %v918_v42 }
 0x53b   :  { %2862 = vmatprep.subr.bf16.mxu1 %v3225_v2 }
 0x53c   :  { %v2635_v19 = vadd.s32 4294967169, %v922_v35  ;;  %v926_v8 = vor.u32 8388608, %v925_v23 }
 0x53e   :  { %v928_v40 = vadd.s32 1, %v2635_v19  ;;  %2863 = vmatpush3.bf16.msra.mxu1 %v3352_v24 }
 0x53f   :  { %2864 = vmatprep.subr.bf16.mxu1 %v3225_v2 }
 0x540   :  { %vm929_vm9 = vcmp.gt.s32.totalorder %v928_v40, 0 }
 0x541   :  { %v930_v21 = vsel %vm929_vm9, %v928_v40, 0  ;;  %v966_v40 = vshll.u32 %v926_v8, 8  ;;  %v888_v8 = vshll.u32 %v3643_v11, %v886_v56  ;;  %vm919_vm9 = vcmp.le.f32.partialorder %v918_v42, 0.7853982 }
 0x542   :  { %v932_v43 = vand.u32 31, %v930_v21  ;;  %2865 = vmatpush3.bf16.msra.mxu1 %v3355_v25  ;;  %v931_v18 = vshrl.u32 %v930_v21, 5 }
 0x543   :  { %2894 = vmatprep.subr.bf16.mxu1 %v3225_v2 }
 0x544   :  { %v933_v44 = vsub.s32 32, %v932_v43  ;;  %v935_v24 = vshll.u32 %v3227_v51, %v932_v43  ;;  %v938_v22 = vshll.u32 %v3228_v53, %v932_v43  ;;  %v941_v50 = vshll.u32 %v3229_v55, %v932_v43 }
 0x545   :  { %v944_v52 = vshll.u32 %v3230_v57, %v932_v43  ;;  %v947_v3 = vshll.u32 %v3231_v59, %v932_v43  ;;  %vm950_vm11 = vcmp.lt.s32.totalorder %v931_v18, 1  ;;  %vm953_vm12 = vcmp.lt.s32.totalorder %v931_v18, 4 }
 0x546   :  { %v936_v14 = vshrl.u32 %v3228_v53, %v933_v44  ;;  %v939_v63 = vshrl.u32 %v3229_v55, %v933_v44  ;;  %v942_v25 = vshrl.u32 %v3230_v57, %v933_v44  ;;  %v945_v0 = vshrl.u32 %v3231_v59, %v933_v44 }
 0x547   :  { %v948_v54 = vshrl.u32 %v3232_v6, %v933_v44  ;;  %v934_v17 = vshrl.u32 %v3227_v51, %v933_v44  ;;  %vm952_vm13 = vcmp.lt.s32.totalorder %v931_v18, 3  ;;  %vm951_vm3 = vcmp.lt.s32.totalorder %v931_v18, 2 }
 0x548   :  { %v937_v34 = vor.u32 %v936_v14, %v935_v24  ;;  %v940_v9 = vor.u32 %v939_v63, %v938_v22  ;;  %v943_v46 = vor.u32 %v942_v25, %v941_v50  ;;  %v946_v41 = vor.u32 %v945_v0, %v944_v52 }
 0x549   :  { %v949_v60 = vor.u32 %v948_v54, %v947_v3  ;;  %v871_v44 = vadd.s32 %v3613_v38, %v3619_v62  ;;  %v887_v52 = vsub.s32 32, %v886_v56  ;;  %v892_v0 = vadd.s32 127, %v891_v61 }
 0x54a   :  { %v955_v7 = vsel %vm953_vm12, %v943_v46, 2102212464  ;;  %v958_v15 = vsel %vm950_vm11, %v937_v34, %v940_v9  ;;  %v962_v26 = vsel %vm950_vm11, %v940_v9, %v943_v46  ;;  %v959_v29 = vsel %vm953_vm12, %v946_v41, 920167782 }
 0x54b   :  { %v963_v35 = vsel %vm953_vm12, %v949_v60, 1326507024  ;;  %v960_v19 = vsel %vm952_vm13, %v943_v46, %v959_v29  ;;  %v954_v21 = vsel %vm950_vm11, %v934_v17, %v937_v34  ;;  %v956_v43 = vsel %vm952_vm13, %v940_v9, %v955_v7 }
 0x54c   :  { %v964_v36 = vsel %vm952_vm13, %v946_v41, %v963_v35  ;;  %v961_v23 = vsel %vm951_vm3, %v958_v15, %v960_v19  ;;  %v957_v25 = vsel %vm951_vm3, %v954_v21, %v956_v43  ;;  %v889_v34 = vshrl.u32 %v871_v44, %v887_v52 }
 0x54d   :  { %v965_v24 = vsel %vm951_vm3, %v962_v26, %v964_v36  ;;  %v3682_v63 = vmul.u32.u64.low %v966_v40, %v961_v23  ;;  %v3683_v50 = vmul.u32.u64.high %v966_v40, %v961_v23, %v3682_v63  ;;  %v973_v3 = vmul.u32 %v966_v40, %v957_v25 }
 0x54e   :  { %v3679_v22 = vmul.u32.u64.low %v966_v40, %v965_v24  ;;  %v3680_v14 = vmul.u32.u64.high %v966_v40, %v965_v24, %v3679_v22  ;;  %v893_v9 = vshll.u32 %v892_v0, 23  ;;  %v890_v60 = vor.u32 %v889_v34, %v888_v8 }
 0x54f   :  { %v976_v18 = vadd.s32 1, %v3683_v50  ;;  %vm907_vm13 = vweird.f32 %v3589_v37 }
 0x550   :  { %vm975_vm4 = vc.u32 %v3680_v14, %v3682_v63  ;;  %v894_v7 = vor.u32 4788187, %v893_v9  ;;  %v897_v62 = vcvt.s32.f32 %v890_v60  ;;  %v974_v43 = vadd.s32 %v3682_v63, %v3680_v14 }
 0x551   :  { %v977_v54 = vsel %vm975_vm4, %v976_v18, %v3683_v50  ;;  %v901_v18 = vsub.s32 4, %v3635_v10 }
 0x552   :  { %v978_v46 = vadd.s32 %v977_v54, %v973_v3  ;;  %v895_v38 = vand.u32 2147483647, %v894_v7 }
 0x553   :  { %v902_v14 = vsel %vm817_vm5, %v901_v18, %v3635_v10 }
 0x554   :  { %v979_v41 = vadd.s32 536870912, %v978_v46  ;;  %v898_v29 = vmul.f32 %v897_v62, %v895_v38  ;;  %v904_v34 = vsel %vm3694_vm7, 0, %v902_v14  ;;  %v3740_v14 = vld [vmem:[#allocation2 + $0x8] sm:$0xff]  }
 0x556   :  { %v980_v15 = vshrl.u32 %v979_v41, 30  ;;  %v899_v36 = vxor.u32 2147483648, %v898_v29 }
 0x558   :  { %v981_v26 = vshll.u32 %v980_v15, 30  ;;  %v900_v21 = vsel %vm817_vm5, %v899_v36, %v898_v29 }
 0x559   :  { %v903_v44 = vsel %vm3694_vm7, %v3589_v37, %v900_v21 }
 0x55a   :  { %v982_v61 = vsub.s32 %v978_v46, %v981_v26  ;;  %3115 = vcosq.f32 %v903_v44  ;;  %v1004_v46 = vsub.s32 4, %v980_v15  ;;  %v908_v26 = vand.u32 3, %v904_v34  ;;  %v3754_v34 = vld [vmem:[#allocation2 + $0x20] sm:$0xff]  }
 0x55b   :  { %3117 = vsinq.f32 %v903_v44 }
 0x55c   :  { %v984_v17 = vsub.s32 0, %v982_v61  ;;  %v1005_v38 = vsel %vm920_vm8, %v1004_v46, %v980_v15  ;;  %vm910_vm10 = vcmp.eq.s32.totalorder %v908_v26, 0  ;;  %vm913_vm11 = vcmp.eq.s32.totalorder %v908_v26, 2 }
 0x55d   :  { %vm909_vm12 = vcmp.lt.s32.totalorder %v908_v26, 2 }
 0x55e   :  { %v2636_v35 = vmin.u32 %v984_v17, %v982_v61 }
 0x560   :  { %v986_v19 = vclz %v2636_v35 }
 0x562   :  { %v2637_v40 = vadd.s32 4294967294, %v986_v19 }
 0x564   :  { %vm2638_vm6 = vcmp.lt.s32.totalorder %v2637_v40, 0  ;;  %v3116_v60 = vpop.eup %3115 }
 0x565   :  { %v989_v56 = vsel %vm2638_vm6, 0, %v2637_v40  ;;  %v3118_v7 = vpop.eup %3117  ;;  %v914_v62 = vxor.u32 2147483648, %v3116_v60  ;;  %vm1010_vm6 = vweird.f32 %v3654_v31 }
 0x566   :  { %v990_v23 = vsub.s32 32, %v989_v56  ;;  %v994_v24 = vsub.s32 4294967266, %v989_v56  ;;  %v991_v22 = vshll.u32 %v982_v61, %v989_v56  ;;  %v911_v10 = vxor.u32 2147483648, %v3118_v7 }
 0x567   :  { %v1007_v61 = vsel %vm919_vm9, 0, %v1005_v38  ;;  %v915_v35 = vsel %vm913_vm11, %v914_v62, %v3118_v7 }
 0x568   :  { %v992_v50 = vshrl.u32 %v974_v43, %v990_v23  ;;  %v995_v25 = vadd.s32 127, %v994_v24  ;;  %v1011_v17 = vand.u32 3, %v1007_v61  ;;  %v912_v29 = vsel %vm910_vm10, %v3116_v60, %v911_v10 }
 0x569   :  { %v916_v36 = vsel %vm909_vm12, %v912_v29, %v915_v35 }
 0x56a   :  { %v993_v52 = vor.u32 %v992_v50, %v991_v22  ;;  %v996_v20 = vshll.u32 %v995_v25, 23  ;;  %vm1016_vm3 = vcmp.eq.s32.totalorder %v1011_v17, 2  ;;  %vm1013_vm4 = vcmp.eq.s32.totalorder %v1011_v17, 0 }
 0x56b   :  { %v917_v15 = vsel %vm907_vm13, nan, %v916_v36  ;;  %vm1012_vm5 = vcmp.lt.s32.totalorder %v1011_v17, 2 }
 0x56c   :  { %v997_v0 = vor.u32 4788187, %v996_v20  ;;  %v1000_v54 = vcvt.s32.f32 %v993_v52 }
 0x56e   :  { %v998_v3 = vand.u32 2147483647, %v997_v0 }
 0x570   :  { %v1001_v8 = vmul.f32 %v1000_v54, %v998_v3 }
 0x572   :  { %v1002_v63 = vxor.u32 2147483648, %v1001_v8 }
 0x574   :  { %v1003_v9 = vsel %vm920_vm8, %v1002_v63, %v1001_v8  ;;  %v3750_v63 = vld [vmem:[#allocation2 + $0x18] sm:$0xff]  }
 0x575   :  { %v1006_v41 = vsel %vm919_vm9, %v3654_v31, %v1003_v9 }
 0x576   :  { %3119 = vcosq.f32 %v1006_v41 }
 0x577   :  { %3121 = vsinq.f32 %v1006_v41 }
 0x580   :  { %v3120_v42 = vpop.eup %3119 }
 0x581   :  { %v3122_v19 = vpop.eup %3121  ;;  %v1017_v40 = vxor.u32 2147483648, %v3120_v42 }
 0x582   :  { %v1014_v11 = vxor.u32 2147483648, %v3122_v19 }
 0x583   :  { %v1018_v56 = vsel %vm1016_vm3, %v1017_v40, %v3122_v19 }
 0x584   :  { %v1015_v21 = vsel %vm1013_vm4, %v3120_v42, %v1014_v11 }
 0x585   :  { %v1019_v43 = vsel %vm1012_vm5, %v1015_v21, %v1018_v56 }
 0x586   :  { %v1020_v23 = vsel %vm1010_vm6, nan, %v1019_v43 }
 0x587   :  { %v1021_v24 = vpack.c.bf16 %v1020_v23, %v917_v15 }
 0x589   :  { %2845 = vmatmul.mubr.msk.bf16.vlgmr.msra.gmra.mrb[12].mxu0 %vm330_vm14, %v1021_v24 }
 0x58a   :  { %2871 = vmatpush3.bf16.msra.mxu0 %v3472_v27  ;;  %2874 = vmatprep.mubr.msk.bf16.mxu0 %vm3226_vm0, %v3225_v2 }
 0x58b   :  { %2872 = vmatprep.subr.bf16.mxu0 %v3225_v2 }
 0x58e   :  { %2873 = vmatpush3.bf16.msra.mxu0 %v3479_v30 }
 0x58f   :  { %2878 = vmatprep.subr.bf16.mxu0 %v3225_v2 }
 0x591   :  { %2875 = vmatmul.mubr.msk.bf16.vlgmr.msra.gmra.mrb[16].mxu0 %vm569_vm2, %v3534_v13 }
 0x592   :  { %2879 = vmatpush3.bf16.msra.mxu0 %v3513_v32  ;;  %2882 = vmatprep.mubr.msk.bf16.mxu0 %vm3226_vm0, %v3225_v2  ;;  %v3065_v32 = vpop.permute.xlu1 %3064 }
 0x593   :  { %2880 = vmatprep.subr.bf16.mxu0 %v3225_v2  ;;  %v3067_v0 = vunpack.i.h.bf16 %v3065_v32 }
 0x596   :  { %2881 = vmatpush3.bf16.msra.mxu0 %v3517_v47  ;;  %v3066_v47 = vunpack.i.l.bf16 %v3065_v32 }
 0x597   :  { %2886 = vmatprep.subr.bf16.mxu0 %v3225_v2 }
 0x5f8   :  { %v3731_v27 = vpop.f32.mrb[8].mxu1 }
 0x5f9   :  { %v2834_v37 = vpop.f32.mrb[9].mxu1 }
 0x5fa   :  { %v3733_v30 = vpop.f32.mrb[10].mxu1 }
 0x5fb   :  { %v2835_v31 = vpop.f32.mrb[11].mxu1 }
 0x600   :  { %v1116_v22 = vpop.f32.mrb[12].mxu1 }
 0x601   :  { %v1117_v13 = vadd.f32 %v3466_v45, %v1116_v22  ;;  %v2852_v50 = vpop.f32.mrb[13].mxu1 }
 0x602   :  { %v1119_v25 = vpop.f32.mrb[14].mxu1 }
 0x603   :  { %v1123_v44 = vmax.f32 %v1117_v13, 0.0  ;;  %v1120_v52 = vadd.f32 %v3466_v45, %v1119_v25  ;;  %v2853_v20 = vpop.f32.mrb[15].mxu1  ;;  %v3746_v45 = vld [vmem:[#allocation2 + $0x10] sm:$0xff]  }
 0x605   :  { %v1124_v18 = vmax.f32 %v1120_v52, 0.0  ;;  %v1133_v3 = vsel %vm330_vm14, %v1123_v44, %v3066_v47 }
 0x607   :  { %v1134_v54 = vsel %vm330_vm14, %v1124_v18, %v3067_v0 }
 0x608   :  { %v1135_v8 = vpack.c.bf16 %v1134_v54, %v1133_v3 }
 0x60a   :  { %2867 = vmatmul.mubr.msk.bf16.vlgmr.msra.gmra.mrb[16].mxu1 %vm495_vm15, %v1135_v8 }
 0x60b   :  { %2895 = vmatpush3.bf16.msra.mxu1 %v3740_v14  ;;  %2902 = vmatprep.mubr.msk.bf16.mxu1 %vm3226_vm0, %v3225_v2 }
 0x60c   :  { %2896 = vmatprep.subr.bf16.mxu1 %v3225_v2 }
 0x60f   :  { %2897 = vmatpush3.bf16.msra.mxu1 %v3746_v45 }
 0x610   :  { %2898 = vmatprep.subr.bf16.mxu1 %v3225_v2 }
 0x613   :  { %2899 = vmatpush3.bf16.msra.mxu1 %v3750_v63 }
 0x614   :  { %2900 = vmatprep.subr.bf16.mxu1 %v3225_v2 }
 0x617   :  { %2901 = vmatpush3.bf16.msra.mxu1 %v3754_v34 }
 0x618   :  { %2928 = vmatprep.subr.bf16.mxu1 %v3225_v2 }
 0x65c   :  { %v3758_v9 = vpop.f32.mrb[12].mxu0 }
 0x65d   :  { %v2846_v46 = vpop.f32.mrb[13].mxu0 }
 0x65e   :  { %v3760_v41 = vpop.f32.mrb[14].mxu0 }
 0x65f   :  { %v2847_v60 = vpop.f32.mrb[15].mxu0 }
 0x664   :  { %v1226_v7 = vpop.f32.mrb[16].mxu0 }
 0x665   :  { %v2876_v26 = vpop.f32.mrb[17].mxu0  ;;  %v1227_v21 = vadd.f32 %v3507_v1, %v1226_v7 }
 0x666   :  { %v1229_v38 = vpop.f32.mrb[18].mxu0 }
 0x667   :  { %v2877_v10 = vpop.f32.mrb[19].mxu0  ;;  %v1230_v23 = vadd.f32 %v3507_v1, %v1229_v38  ;;  %v1060_v38 = vadd.f32 %v3556_v58, %v3758_v9  ;;  %v2648_v9 = vld [vmem:[%s4295_s1 + $0x20] sm:$0xff] }
 0x6dd   :  { %v1173_v62 = vpop.f32.mrb[16].mxu1 }
 0x6de   :  { %v1174_v61 = vadd.f32 %v3496_v33, %v1173_v62  ;;  %v2868_v17 = vpop.f32.mrb[17].mxu1 }
 0x6df   :  { %v1176_v29 = vpop.f32.mrb[18].mxu1 }
 0x6e0   :  { %v2643_v35 = vmul.f32 -1.442695, %v1174_v61  ;;  %v1177_v42 = vadd.f32 %v3496_v33, %v1176_v29  ;;  %v2869_v19 = vpop.f32.mrb[19].mxu1 }
 0x6e2   :  { %3123 = vpow2.f32 %v2643_v35  ;;  %v2644_v36 = vmul.f32 -1.442695, %v1177_v42 }
 0x6e4   :  { %3125 = vpow2.f32 %v2644_v36 }
 0x6ec   :  { %v3124_v40 = vpop.eup %3123 }
 0x6ed   :  { %v1186_v11 = vadd.f32 1.0, %v3124_v40 }
 0x6ee   :  { %v3126_v56 = vpop.eup %3125 }
 0x6ef   :  { %3127 = vrcp.f32 %v1186_v11  ;;  %v1187_v15 = vadd.f32 1.0, %v3126_v56 }
 0x6f1   :  { %3129 = vrcp.f32 %v1187_v15  ;;  %v2649_v15 = vld [vmem:[%s4295_s1 + $0x28] sm:$0xff] }
 0x6f9   :  { %v3128_v43 = vpop.eup %3127 }
 0x6fa   :  { %v1233_v24 = vmul.f32 %v3128_v43, %v1227_v21  ;;  %v1247_v1 = vsub.f32 1.0, %v3128_v43  ;;  %v1259_v47 = vmul.f32 %v3128_v43, %v3527_v49 }
 0x6fb   :  { %v3130_v37 = vpop.eup %3129 }
 0x6fc   :  { %1237 = vrot.lane.b32.xlu0 %v1233_v24, %s3222_s28  ;;  %v1234_v33 = vmul.f32 %v3130_v37, %v1230_v23  ;;  %v1248_v20 = vsub.f32 1.0, %v3130_v37  ;;  %v1260_v18 = vmul.f32 %v3130_v37, %v3529_v12 }
 0x6fe   :  { %1239 = vrot.lane.b32.xlu1 %v1234_v33, %s3222_s28 }
 0x76e   :  { %v1238_v31 = vpop.permute.xlu0 %1237 }
 0x76f   :  { %v1243_v22 = vadd.f32 %v1238_v31, %v1174_v61  ;;  %v1063_v61 = vadd.f32 %v3556_v58, %v3760_v41 }
 0x770   :  { %v1240_v13 = vpop.permute.xlu1 %1239 }
 0x771   :  { %3131 = vtanh.f32 %v1243_v22  ;;  %v1244_v50 = vadd.f32 %v1240_v13, %v1177_v42  ;;  %v1067_v29 = vmax.f32 %v1063_v61, 0.0 }
 0x773   :  { %3133 = vtanh.f32 %v1244_v50 }
 0x77b   :  { %v3132_v32 = vpop.eup %3131 }
 0x77c   :  { %1251 = vrot.lane.b32.xlu0 %v3132_v32, %s3233_s21 }
 0x77d   :  { %v3134_v25 = vpop.eup %3133 }
 0x77e   :  { %1253 = vrot.lane.b32.xlu1 %v3134_v25, %s3233_s21 }
 0x7ee   :  { %v1252_v44 = vpop.permute.xlu0 %1251 }
 0x7ef   :  { %v1257_v52 = vmul.f32 %v1252_v44, %v1247_v1 }
 0x7f0   :  { %v1254_v0 = vpop.permute.xlu1 %1253 }
 0x7f1   :  { %v1258_v3 = vmul.f32 %v1254_v0, %v1248_v20  ;;  %v3772_v54 = vadd.f32 %v1259_v47, %v1257_v52 }
 0x7f3   :  { %v3774_v8 = vadd.f32 %v1260_v18, %v1258_v3 }
 0x7f5   :  { %v1263_v46 = vpack.c.bf16 %v3774_v8, %v3772_v54 }
 0x7f7   :  { %1265 = vrot.lane.b32.xlu0 %v1263_v46, %s3233_s21 }
 0x869   :  { %v3779_v60 = vpop.permute.xlu0 %1265 }
 0x86a   :  { %2883 = vmatmul.mubr.msk.bf16.vlgmr.msra.gmra.mrb[20].mxu0 %vm569_vm2, %v3779_v60 }
 0x86b   :  { %2887 = vmatpush3.bf16.msra.mxu0 %v3574_v39  ;;  %2890 = vmatprep.mubr.msk.bf16.mxu0 %vm3226_vm0, %v3225_v2 }
 0x86c   :  { %2888 = vmatprep.subr.bf16.mxu0 %v3225_v2 }
 0x86f   :  { %2889 = vmatpush3.bf16.msra.mxu0 %v3577_v48  ;;  %v1066_v48 = vmax.f32 %v1060_v38, 0.0 }
 0x870   :  { %2906 = vmatprep.subr.bf16.mxu0 %v3225_v2 }
 0x93d   :  { %v1304_v49 = vpop.f32.mrb[20].mxu0 }
 0x93e   :  { %v1305_v12 = vadd.f32 %v3551_v16, %v1304_v49  ;;  %v2884_v7 = vpop.f32.mrb[21].mxu0 }
 0x93f   :  { %v1307_v26 = vpop.f32.mrb[22].mxu0 }
 0x940   :  { %v1311_v10 = vmax.f32 %v1305_v12, 0.0  ;;  %v1308_v39 = vadd.f32 %v3551_v16, %v1307_v26  ;;  %v2885_v62 = vpop.f32.mrb[23].mxu0  ;;  %v3068_v16 = vpack.i.bf16 %v3774_v8, %v3772_v54 }
 0x942   :  { %v1312_v17 = vmax.f32 %v1308_v39, 0.0  ;;  %1315 = vrot.lane.b32.xlu1 %v1311_v10, %s3234_s22 }
 0x944   :  { %1317 = vrot.lane.b32.xlu0 %v1312_v17, %s3234_s22 }
 0x946   :  { %1325 = vrot.lane.b32.xlu1 %v1066_v48, %s3234_s22 }
 0x948   :  { %1327 = vrot.lane.b32.xlu0 %v1067_v29, %s3234_s22 }
 0x94c   :  { %1386 = vperm.xlu0 %3056, %v2648_v9  }
 0x950   :  { %3069 = vrot.lane.b32.xlu0 %v3068_v16, %s3234_s22 }
 0x9b4   :  { %v1316_v58 = vpop.permute.xlu1 %1315 }
 0x9b5   :  { %v1321_v42 = vadd.f32 %v1316_v58, %v3772_v54 }
 0x9b6   :  { %v1318_v41 = vpop.permute.xlu0 %1317 }
 0x9b7   :  { %v1322_v19 = vadd.f32 %v1318_v41, %v3774_v8 }
 0x9b8   :  { %v1326_v35 = vpop.permute.xlu1 %1325 }
 0x9b9   :  { %v1331_v40 = vmul.f32 %v1326_v35, %v1321_v42 }
 0x9ba   :  { %v1328_v36 = vpop.permute.xlu0 %1327 }
 0x9bb   :  { %v1332_v11 = vmul.f32 %v1328_v36, %v1322_v19 }
 0x9bd   :  { %v1333_v56 = vpack.c.bf16 %v1332_v11, %v1331_v40 }
 0x9bf   :  { %1335 = vrot.lane.b32.xlu1 %v1333_v56, %s3233_s21 }
 0x9c3   :  { %1391 = vperm.xlu1 %3062, %v2649_v15  }
 0x9cb   :  { %v1387_v21 = vpop.permute.xlu0 %1386 }
 0x9cc   :  { %v3812_v43 = vmul.f32 %v1387_v21, %v3360_v28 }
 0x9ce   :  { %v1399_v23 = vand.u32 2139095040, %v3812_v43  ;;  %v1396_v25 = vand.u32 2147483647, %v3812_v43 }
 0x9d0   :  { %v1400_v24 = vshrl.u32 %v1399_v23, 23  ;;  %v1403_v7 = vand.u32 8388607, %v1396_v25 }
 0x9d2   :  { %v2650_v37 = vadd.s32 4294967169, %v1400_v24  ;;  %v1404_v61 = vor.u32 8388608, %v1403_v7 }
 0x9d4   :  { %v1406_v33 = vadd.s32 1, %v2650_v37  ;;  %v1444_v41 = vshll.u32 %v1404_v61, 8 }
 0x9d6   :  { %vm1407_vm7 = vcmp.gt.s32.totalorder %v1406_v33, 0 }
 0x9d7   :  { %v1408_v31 = vsel %vm1407_vm7, %v1406_v33, 0 }
 0x9d8   :  { %v1410_v22 = vand.u32 31, %v1408_v31  ;;  %v1409_v1 = vshrl.u32 %v1408_v31, 5  ;;  %v2659_v31 = vld [vmem:[%s4294_s0 + $0x4] sm:$0x3] }
 0x9da   :  { %v1411_v13 = vsub.s32 32, %v1410_v22  ;;  %v1422_v44 = vshll.u32 %v3230_v57, %v1410_v22  ;;  %v1425_v47 = vshll.u32 %v3231_v59, %v1410_v22  ;;  %v1413_v3 = vshll.u32 %v3227_v51, %v1410_v22 }
 0x9db   :  { %v1416_v46 = vshll.u32 %v3228_v53, %v1410_v22  ;;  %v1419_v49 = vshll.u32 %v3229_v55, %v1410_v22  ;;  %vm1431_vm8 = vcmp.lt.s32.totalorder %v1409_v1, 4  ;;  %vm1428_vm9 = vcmp.lt.s32.totalorder %v1409_v1, 1 }
 0x9dc   :  { %v1423_v50 = vshrl.u32 %v3231_v59, %v1411_v13  ;;  %v1426_v32 = vshrl.u32 %v3232_v6, %v1411_v13  ;;  %v1414_v52 = vshrl.u32 %v3228_v53, %v1411_v13  ;;  %v1417_v20 = vshrl.u32 %v3229_v55, %v1411_v13 }
 0x9dd   :  { %v1420_v0 = vshrl.u32 %v3230_v57, %v1411_v13  ;;  %vm1430_vm10 = vcmp.lt.s32.totalorder %v1409_v1, 3  ;;  %vm1429_vm11 = vcmp.lt.s32.totalorder %v1409_v1, 2  ;;  %v1412_v11 = vshrl.u32 %v3227_v51, %v1411_v13  ;;  %v3855_v1 = vld [vmem:[#allocation2] sm:$0xff]  }
 0x9de   :  { %v1424_v18 = vor.u32 %v1423_v50, %v1422_v44  ;;  %v1427_v12 = vor.u32 %v1426_v32, %v1425_v47  ;;  %v1415_v26 = vor.u32 %v1414_v52, %v1413_v3  ;;  %v1418_v38 = vor.u32 %v1417_v20, %v1416_v46 }
 0x9df   :  { %v1421_v10 = vor.u32 %v1420_v0, %v1419_v49  ;;  %v1654_v50 = vrot.slane %v2659_v31, %v3285_v4  ;;  %v1658_v32 = vrot.slane %v2659_v31, %v3287_v5  ;;  %v3865_v0 = vld [vmem:[#allocation2 + $0x28] sm:$0xff]  }
 0x9e0   :  { %v1437_v39 = vsel %vm1431_vm8, %v1424_v18, 920167782  ;;  %v1441_v62 = vsel %vm1431_vm8, %v1427_v12, 1326507024  ;;  %v1436_v17 = vsel %vm1428_vm9, %v1415_v26, %v1418_v38  ;;  %v1432_v56 = vsel %vm1428_vm9, %v1412_v11, %v1415_v26  ;;  %v3881_v12 = vld [vmem:[#allocation2 + $0x38] sm:$0xff]  }
 0x9e1   :  { %v1438_v48 = vsel %vm1430_vm10, %v1421_v10, %v1437_v39  ;;  %v1440_v29 = vsel %vm1428_vm9, %v1418_v38, %v1421_v10  ;;  %v1442_v9 = vsel %vm1430_vm10, %v1424_v18, %v1441_v62  ;;  %v1433_v40 = vsel %vm1431_vm8, %v1421_v10, 2102212464  ;;  %v3873_v18 = vld [vmem:[#allocation2 + $0x30] sm:$0xff]   ;;  %v3887_v10 = vld [vmem:[#allocation2 + $0x40] sm:$0xff]  }
 0x9e2   :  { %v1439_v16 = vsel %vm1429_vm11, %v1436_v17, %v1438_v48  ;;  %v1443_v58 = vsel %vm1429_vm11, %v1440_v29, %v1442_v9  ;;  %v1434_v15 = vsel %vm1430_vm10, %v1418_v38, %v1433_v40  ;;  %v1659_v52 = vpack.c.bf16 %v1658_v32, %v1654_v50  ;;  %v3891_v17 = vld [vmem:[#allocation2 + $0x48] sm:$0xff]  }
 0x9e3   :  { %v3834_v35 = vmul.u32.u64.low %v1444_v41, %v1439_v16  ;;  %v3835_v42 = vmul.u32.u64.high %v1444_v41, %v1439_v16, %v3834_v35  ;;  %v3838_v19 = vmul.u32.u64.low %v1444_v41, %v1443_v58  ;;  %v3839_v36 = vmul.u32.u64.high %v1444_v41, %v1443_v58, %v3838_v19  ;;  %v3896_v58 = vld [vmem:[#allocation2 + $0x50] sm:$0xff]  }
 0x9e4   :  { %v1435_v23 = vsel %vm1429_vm11, %v1432_v56, %v1434_v15  ;;  %vm1398_vm10 = vcmp.lt.s32.totalorder %v3812_v43, 0  ;;  %vm3932_vm11 = vcmp.le.f32.partialorder %v1396_v25, 0.7853982 }
 0x9e5   :  { %v1454_v21 = vadd.s32 1, %v3835_v42  ;;  %vm1453_vm12 = vc.u32 %v3839_v36, %v3834_v35  ;;  %v1451_v37 = vmul.u32 %v1444_v41, %v1435_v23 }
 0x9e7   :  { %v1455_v24 = vsel %vm1453_vm12, %v1454_v21, %v3835_v42 }
 0x9e8   :  { %v1456_v33 = vadd.s32 %v1455_v24, %v1451_v37 }
 0x9ea   :  { %v1457_v13 = vadd.s32 536870912, %v1456_v33 }
 0x9ec   :  { %v3861_v44 = vshrl.u32 %v1457_v13, 30 }
 0x9ee   :  { %v1459_v20 = vshll.u32 %v3861_v44, 30 }
 0x9f0   :  { %v3871_v47 = vsub.s32 %v1456_v33, %v1459_v20 }
 0x9f2   :  { %v1462_v3 = vsub.s32 0, %v3871_v47 }
 0x9f4   :  { %v2651_v26 = vmin.u32 %v1462_v3, %v3871_v47 }
 0x9f6   :  { %v1464_v62 = vclz %v2651_v26 }
 0x9f8   :  { %v2652_v29 = vadd.s32 4294967294, %v1464_v62 }
 0x9fa   :  { %vm2653_vm3 = vcmp.lt.s32.totalorder %v2652_v29, 0 }
 0x9fb   :  { %v1467_v3 = vsel %vm2653_vm3, 0, %v2652_v29 }
 0xa31   :  { %v1336_v22 = vpop.permute.xlu1 %1335 }
 0xa32   :  { %2891 = vmatmul.mubr.msk.bf16.vlgmr.msra.gmra.mrb[24].mxu0 %vm569_vm2, %v1336_v22 }
 0xa33   :  { %2907 = vmatpush3.bf16.msra.mxu0 %v3855_v1  ;;  %2908 = vmatprep.mubr.msk.bf16.mxu0 %vm3226_vm0, %v3225_v2 }
 0xa34   :  { %2912 = vmatprep.subr.bf16.mxu0 %v3225_v2 }
 0xa3a   :  { %2909 = vmatmul.mubr.msk.bf16.vlgmr.msra.gmra.mrb[28].mxu0 %vm397_vm1, %v1659_v52 }
 0xa3b   :  { %2913 = vmatpush3.bf16.msra.mxu0 %v3865_v0  ;;  %2924 = vmatprep.mubr.msk.bf16.mxu0 %vm3226_vm0, %v3225_v2 }
 0xa3c   :  { %2914 = vmatprep.subr.bf16.mxu0 %v3225_v2 }
 0xa3f   :  { %2915 = vmatpush3.bf16.msra.mxu0 %v3873_v18 }
 0xa40   :  { %2916 = vmatprep.subr.bf16.mxu0 %v3225_v2 }
 0xa42   :  { %v1392_v46 = vpop.permute.xlu1 %1391 }
 0xa43   :  { %v3879_v49 = vmul.f32 %v1392_v46, %v3360_v28  ;;  %2917 = vmatpush3.bf16.msra.mxu0 %v3881_v12 }
 0xa44   :  { %2918 = vmatprep.subr.bf16.mxu0 %v3225_v2 }
 0xa45   :  { %v1502_v7 = vand.u32 2139095040, %v3879_v49  ;;  %v1499_v48 = vand.u32 2147483647, %v3879_v49  ;;  %vm1501_vm12 = vcmp.lt.s32.totalorder %v3879_v49, 0 }
 0xa47   :  { %v1503_v38 = vshrl.u32 %v1502_v7, 23  ;;  %2919 = vmatpush3.bf16.msra.mxu0 %v3887_v10  ;;  %v1506_v41 = vand.u32 8388607, %v1499_v48 }
 0xa48   :  { %2920 = vmatprep.subr.bf16.mxu0 %v3225_v2 }
 0xa49   :  { %v2654_v39 = vadd.s32 4294967169, %v1503_v38  ;;  %v1507_v22 = vor.u32 8388608, %v1506_v41 }
 0xa4b   :  { %v1509_v61 = vadd.s32 1, %v2654_v39  ;;  %2921 = vmatpush3.bf16.msra.mxu0 %v3891_v17 }
 0xa4c   :  { %2922 = vmatprep.subr.bf16.mxu0 %v3225_v2 }
 0xa4d   :  { %vm1510_vm13 = vcmp.gt.s32.totalorder %v1509_v61, 0 }
 0xa4e   :  { %v1511_v9 = vsel %vm1510_vm13, %v1509_v61, 0  ;;  %vm1500_vm13 = vcmp.le.f32.partialorder %v1499_v48, 0.7853982 }
 0xa4f   :  { %v1513_v16 = vand.u32 31, %v1511_v9  ;;  %2923 = vmatpush3.bf16.msra.mxu0 %v3896_v58  ;;  %v1512_v19 = vshrl.u32 %v1511_v9, 5 }
 0xa50   :  { %2952 = vmatprep.subr.bf16.mxu0 %v3225_v2 }
 0xa51   :  { %v1514_v42 = vsub.s32 32, %v1513_v16  ;;  %v1516_v40 = vshll.u32 %v3227_v51, %v1513_v16  ;;  %v1519_v11 = vshll.u32 %v3228_v53, %v1513_v16  ;;  %v1522_v21 = vshll.u32 %v3229_v55, %v1513_v16 }
 0xa52   :  { %v1525_v24 = vshll.u32 %v3230_v57, %v1513_v16  ;;  %v1528_v33 = vshll.u32 %v3231_v59, %v1513_v16  ;;  %vm1531_vm4 = vcmp.lt.s32.totalorder %v1512_v19, 1  ;;  %vm1534_vm5 = vcmp.lt.s32.totalorder %v1512_v19, 4 }
 0xa53   :  { %v1517_v56 = vshrl.u32 %v3228_v53, %v1514_v42  ;;  %v1520_v15 = vshrl.u32 %v3229_v55, %v1514_v42  ;;  %v1523_v23 = vshrl.u32 %v3230_v57, %v1514_v42  ;;  %v1526_v37 = vshrl.u32 %v3231_v59, %v1514_v42 }
 0xa54   :  { %v1529_v31 = vshrl.u32 %v3232_v6, %v1514_v42  ;;  %v1515_v38 = vshrl.u32 %v3227_v51, %v1514_v42  ;;  %vm1533_vm6 = vcmp.lt.s32.totalorder %v1512_v19, 3  ;;  %vm1532_vm7 = vcmp.lt.s32.totalorder %v1512_v19, 2 }
 0xa55   :  { %v1518_v13 = vor.u32 %v1517_v56, %v1516_v40  ;;  %v1521_v50 = vor.u32 %v1520_v15, %v1519_v11  ;;  %v1524_v32 = vor.u32 %v1523_v23, %v1522_v21  ;;  %v1527_v52 = vor.u32 %v1526_v37, %v1525_v24 }
 0xa56   :  { %v1530_v20 = vor.u32 %v1529_v31, %v1528_v33  ;;  %v1547_v16 = vshll.u32 %v1507_v22, 8  ;;  %v1472_v24 = vsub.s32 4294967266, %v1467_v3  ;;  %v1468_v22 = vsub.s32 32, %v1467_v3 }
 0xa57   :  { %v1536_v46 = vsel %vm1534_vm5, %v1524_v32, 2102212464  ;;  %v1539_v7 = vsel %vm1531_vm4, %v1518_v13, %v1521_v50  ;;  %v1543_v26 = vsel %vm1531_vm4, %v1521_v50, %v1524_v32  ;;  %v1540_v39 = vsel %vm1534_vm5, %v1527_v52, 920167782 }
 0xa58   :  { %v1544_v62 = vsel %vm1534_vm5, %v1530_v20, 1326507024  ;;  %v1541_v61 = vsel %vm1533_vm6, %v1524_v32, %v1540_v39  ;;  %v1535_v41 = vsel %vm1531_vm4, %v1515_v38, %v1518_v13  ;;  %v1537_v40 = vsel %vm1533_vm6, %v1521_v50, %v1536_v46 }
 0xa59   :  { %v1545_v9 = vsel %vm1533_vm6, %v1527_v52, %v1544_v62  ;;  %v1542_v11 = vsel %vm1532_vm7, %v1539_v7, %v1541_v61  ;;  %v1538_v37 = vsel %vm1532_vm7, %v1535_v41, %v1537_v40  ;;  %v1473_v19 = vadd.s32 127, %v1472_v24 }
 0xa5a   :  { %v1546_v56 = vsel %vm1532_vm7, %v1543_v26, %v1545_v9  ;;  %v3917_v29 = vmul.u32.u64.low %v1547_v16, %v1542_v11  ;;  %v3918_v23 = vmul.u32.u64.high %v1547_v16, %v1542_v11, %v3917_v29  ;;  %v1554_v33 = vmul.u32 %v1547_v16, %v1538_v37 }
 0xa5b   :  { %v3914_v15 = vmul.u32.u64.low %v1547_v16, %v1546_v56  ;;  %v3915_v21 = vmul.u32.u64.high %v1547_v16, %v1546_v56, %v3914_v15  ;;  %v1452_v50 = vadd.s32 %v3834_v35, %v3839_v36  ;;  %v1474_v32 = vshll.u32 %v1473_v19, 23  ;;  %v3952_v19 = vld [vmem:[#allocation2 + $0x58] sm:$0xff]  }
 0xa5c   :  { %v1557_v42 = vadd.s32 1, %v3918_v23  ;;  %v1469_v7 = vshll.u32 %v3871_v47, %v1467_v3 }
 0xa5d   :  { %vm1556_vm8 = vc.u32 %v3915_v21, %v3917_v29  ;;  %v1470_v20 = vshrl.u32 %v1452_v50, %v1468_v22  ;;  %v1475_v26 = vor.u32 4788187, %v1474_v32  ;;  %v1555_v36 = vadd.s32 %v3917_v29, %v3915_v21 }
 0xa5e   :  { %v1558_v31 = vsel %vm1556_vm8, %v1557_v42, %v3918_v23  ;;  %v1482_v32 = vsub.s32 4, %v3861_v44 }
 0xa5f   :  { %v1559_v13 = vadd.s32 %v1558_v31, %v1554_v33  ;;  %v1471_v39 = vor.u32 %v1470_v20, %v1469_v7  ;;  %v1476_v61 = vand.u32 2147483647, %v1475_v26 }
 0xa60   :  { %v1483_v7 = vsel %vm1398_vm10, %v1482_v32, %v3861_v44 }
 0xa61   :  { %v1560_v52 = vadd.s32 536870912, %v1559_v13  ;;  %v1478_v16 = vcvt.s32.f32 %v1471_v39  ;;  %v1485_v39 = vsel %vm3932_vm11, 0, %v1483_v7 }
 0xa63   :  { %v1561_v46 = vshrl.u32 %v1560_v52, 30  ;;  %v1479_v40 = vmul.f32 %v1478_v16, %v1476_v61 }
 0xa65   :  { %v1562_v38 = vshll.u32 %v1561_v46, 30  ;;  %v1480_v15 = vxor.u32 2147483648, %v1479_v40  ;;  %v1585_v20 = vsub.s32 4, %v1561_v46 }
 0xa67   :  { %v1563_v62 = vsub.s32 %v1559_v13, %v1562_v38  ;;  %v1481_v47 = vsel %vm1398_vm10, %v1480_v15, %v1479_v40  ;;  %vm1591_vm10 = vweird.f32 %v3879_v49 }
 0xa68   :  { %v1484_v21 = vsel %vm3932_vm11, %v3812_v43, %v1481_v47 }
 0xa69   :  { %v1565_v9 = vsub.s32 0, %v1563_v62  ;;  %3135 = vcosq.f32 %v1484_v21 }
 0xa6a   :  { %3137 = vsinq.f32 %v1484_v21 }
 0xa6b   :  { %v2655_v41 = vmin.u32 %v1565_v9, %v1563_v62  ;;  %v1489_v9 = vand.u32 3, %v1485_v39 }
 0xa6d   :  { %v1567_v11 = vclz %v2655_v41  ;;  %vm1491_vm3 = vcmp.eq.s32.totalorder %v1489_v9, 0  ;;  %vm1494_vm4 = vcmp.eq.s32.totalorder %v1489_v9, 2  ;;  %vm1490_vm5 = vcmp.lt.s32.totalorder %v1489_v9, 2 }
 0xa6f   :  { %v2656_v56 = vadd.s32 4294967294, %v1567_v11 }
 0xa71   :  { %vm2657_vm9 = vcmp.lt.s32.totalorder %v2656_v56, 0 }
 0xa72   :  { %v1570_v35 = vsel %vm2657_vm9, 0, %v2656_v56  ;;  %vm1488_vm9 = vweird.f32 %v3812_v43  ;;  %v3964_v43 = vld [vmem:[#allocation2 + $0x68] sm:$0xff]  }
 0xa73   :  { %v1571_v23 = vsub.s32 32, %v1570_v35  ;;  %v1575_v24 = vsub.s32 4294967266, %v1570_v35  ;;  %v1572_v3 = vshll.u32 %v1563_v62, %v1570_v35  ;;  %v3136_v38 = vpop.eup %3135  ;;  %v1586_v62 = vsel %vm1501_vm12, %v1585_v20, %v1561_v46 }
 0xa74   :  { %v3138_v61 = vpop.eup %3137  ;;  %v1588_v16 = vsel %vm1500_vm13, 0, %v1586_v62  ;;  %v1495_v48 = vxor.u32 2147483648, %v3136_v38 }
 0xa75   :  { %v1573_v37 = vshrl.u32 %v1555_v36, %v1571_v23  ;;  %v1576_v42 = vadd.s32 127, %v1575_v24  ;;  %v1492_v41 = vxor.u32 2147483648, %v3138_v61  ;;  %v1592_v40 = vand.u32 3, %v1588_v16 }
 0xa76   :  { %v1496_v44 = vsel %vm1494_vm4, %v1495_v48, %v3138_v61 }
 0xa77   :  { %v1574_v33 = vor.u32 %v1573_v37, %v1572_v3  ;;  %v1577_v31 = vshll.u32 %v1576_v42, 23  ;;  %v1493_v56 = vsel %vm1491_vm3, %v3136_v38, %v1492_v41  ;;  %vm1597_vm6 = vcmp.eq.s32.totalorder %v1592_v40, 2 }
 0xa78   :  { %v1497_v23 = vsel %vm1490_vm5, %v1493_v56, %v1496_v44  ;;  %vm1594_vm7 = vcmp.eq.s32.totalorder %v1592_v40, 0  ;;  %vm1593_vm8 = vcmp.lt.s32.totalorder %v1592_v40, 2 }
 0xa79   :  { %v1578_v29 = vor.u32 4788187, %v1577_v31  ;;  %v1581_v13 = vcvt.s32.f32 %v1574_v33  ;;  %v1498_v3 = vsel %vm1488_vm9, nan, %v1497_v23  ;;  %v3958_v33 = vld [vmem:[#allocation2 + $0x60] sm:$0xff]  }
 0xa7b   :  { %v1579_v22 = vand.u32 2147483647, %v1578_v29 }
 0xa7d   :  { %v1582_v50 = vmul.f32 %v1581_v13, %v1579_v22  ;;  %v3981_v13 = vld [vmem:[%s4298_s4] ss:$0 sm:$0xff] }
 0xa7f   :  { %v1583_v52 = vxor.u32 2147483648, %v1582_v50 }
 0xa81   :  { %v1584_v25 = vsel %vm1501_vm12, %v1583_v52, %v1582_v50  ;;  %v3070_v52 = vpop.permute.xlu0 %3069 }
 0xa82   :  { %v1587_v26 = vsel %vm1500_vm13, %v3879_v49, %v1584_v25  ;;  %v3970_v49 = vld [vmem:[#allocation2 + $0x70] sm:$0xff]   ;;  %v3072_v38 = vunpack.i.h.bf16 %v3070_v52  ;;  %v3071_v39 = vunpack.i.l.bf16 %v3070_v52 }
 0xa83   :  { %3139 = vcosq.f32 %v1587_v26 }
 0xa84   :  { %3141 = vsinq.f32 %v1587_v26 }
 0xa8d   :  { %v3140_v11 = vpop.eup %3139 }
 0xa8e   :  { %v3142_v15 = vpop.eup %3141  ;;  %v1598_v35 = vxor.u32 2147483648, %v3140_v11 }
 0xa8f   :  { %v1595_v36 = vxor.u32 2147483648, %v3142_v15 }
 0xa90   :  { %v1599_v24 = vsel %vm1597_vm6, %v1598_v35, %v3142_v15 }
 0xa91   :  { %v1596_v46 = vsel %vm1594_vm7, %v3140_v11, %v1595_v36 }
 0xa92   :  { %v1600_v47 = vsel %vm1593_vm8, %v1596_v46, %v1599_v24 }
 0xa93   :  { %v1601_v37 = vsel %vm1591_vm10, nan, %v1600_v47 }
 0xa94   :  { %v1602_v42 = vpack.c.bf16 %v1601_v37, %v1498_v3 }
 0xa96   :  { %2903 = vmatmul.mubr.msk.bf16.vlgmr.msra.gmra.mrb[20].mxu1 %vm330_vm14, %v1602_v42 }
 0xa97   :  { %2929 = vmatpush3.bf16.msra.mxu1 %v3952_v19  ;;  %2932 = vmatprep.mubr.msk.bf16.mxu1 %vm3226_vm0, %v3225_v2 }
 0xa98   :  { %2930 = vmatprep.subr.bf16.mxu1 %v3225_v2 }
 0xa9b   :  { %2931 = vmatpush3.bf16.msra.mxu1 %v3958_v33 }
 0xa9c   :  { %2936 = vmatprep.subr.bf16.mxu1 %v3225_v2 }
 0xa9e   :  { %2933 = vmatmul.mubr.msk.bf16.vlgmr.msra.gmra.mrb[24].mxu1 %vm569_vm2, %v3779_v60 }
 0xa9f   :  { %2937 = vmatpush3.bf16.msra.mxu1 %v3964_v43  ;;  %2940 = vmatprep.mubr.msk.bf16.mxu1 %vm3226_vm0, %v3225_v2 }
 0xaa0   :  { %2938 = vmatprep.subr.bf16.mxu1 %v3225_v2 }
 0xaa3   :  { %2939 = vmatpush3.bf16.msra.mxu1 %v3970_v49 }
 0xaa4   :  { %2944 = vmatprep.subr.bf16.mxu1 %v3225_v2 }
 0xb05   :  { %v3974_v31 = vpop.f32.mrb[24].mxu0 }
 0xb06   :  { %v2892_v21 = vpop.f32.mrb[25].mxu0 }
 0xb07   :  { %v3976_v29 = vpop.f32.mrb[26].mxu0 }
 0xb08   :  { %v2893_v60 = vpop.f32.mrb[27].mxu0 }
 0xb09   :  { %v4012_v60 = vld [vmem:[%s4298_s4 + $0x3] ss:$0 sm:$0xff] }
 0xb0d   :  { %v1697_v22 = vpop.f32.mrb[28].mxu0 }
 0xb0e   :  { %v1698_v50 = vadd.f32 %v3981_v13, %v1697_v22  ;;  %v2910_v32 = vpop.f32.mrb[29].mxu0 }
 0xb0f   :  { %v1700_v25 = vpop.f32.mrb[30].mxu0 }
 0xb10   :  { %v1704_v20 = vmax.f32 %v1698_v50, 0.0  ;;  %v1701_v7 = vadd.f32 %v3981_v13, %v1700_v25  ;;  %v2911_v26 = vpop.f32.mrb[31].mxu0 }
 0xb12   :  { %v1705_v62 = vmax.f32 %v1701_v7, 0.0  ;;  %v1714_v61 = vsel %vm330_vm14, %v1704_v20, %v3071_v39 }
 0xb14   :  { %v1715_v9 = vsel %vm330_vm14, %v1705_v62, %v3072_v38 }
 0xb15   :  { %v1716_v16 = vpack.c.bf16 %v1715_v9, %v1714_v61 }
 0xb17   :  { %2925 = vmatmul.mubr.msk.bf16.vlgmr.msra.gmra.mrb[32].mxu0 %vm495_vm15, %v1716_v16 }
 0xb18   :  { %2953 = vmatpush3.bf16.msra.mxu0 %v3740_v14  ;;  %2960 = vmatprep.mubr.msk.bf16.mxu0 %vm3226_vm0, %v3225_v2 }
 0xb19   :  { %2954 = vmatprep.subr.bf16.mxu0 %v3225_v2 }
 0xb1c   :  { %2955 = vmatpush3.bf16.msra.mxu0 %v3746_v45 }
 0xb1d   :  { %2956 = vmatprep.subr.bf16.mxu0 %v3225_v2 }
 0xb20   :  { %2957 = vmatpush3.bf16.msra.mxu0 %v3750_v63  ;;  %v4005_v63 = vld [vmem:[%s4298_s4 + $0x2] ss:$0 sm:$0xff] }
 0xb21   :  { %2958 = vmatprep.subr.bf16.mxu0 %v3225_v2 }
 0xb24   :  { %2959 = vmatpush3.bf16.msra.mxu0 %v3754_v34 }
 0xb25   :  { %2986 = vmatprep.subr.bf16.mxu0 %v3225_v2 }
 0xb69   :  { %v3998_v41 = vpop.f32.mrb[20].mxu1 }
 0xb6a   :  { %v2904_v14 = vpop.f32.mrb[21].mxu1 }
 0xb6b   :  { %v4000_v48 = vpop.f32.mrb[22].mxu1 }
 0xb6c   :  { %v2905_v40 = vpop.f32.mrb[23].mxu1 }
 0xb71   :  { %v1807_v11 = vpop.f32.mrb[24].mxu1 }
 0xb72   :  { %v2934_v56 = vpop.f32.mrb[25].mxu1  ;;  %v1808_v22 = vadd.f32 %v4012_v60, %v1807_v11 }
 0xb73   :  { %v1810_v44 = vpop.f32.mrb[26].mxu1 }
 0xb74   :  { %v2935_v45 = vpop.f32.mrb[27].mxu1  ;;  %v1811_v32 = vadd.f32 %v4012_v60, %v1810_v44 }
 0xbea   :  { %v1754_v15 = vpop.f32.mrb[32].mxu0 }
 0xbeb   :  { %v1755_v34 = vadd.f32 %v4005_v63, %v1754_v15  ;;  %v2926_v35 = vpop.f32.mrb[33].mxu0 }
 0xbec   :  { %v1757_v36 = vpop.f32.mrb[34].mxu0 }
 0xbed   :  { %v2662_v23 = vmul.f32 -1.442695, %v1755_v34  ;;  %v1758_v24 = vadd.f32 %v4005_v63, %v1757_v36  ;;  %v2927_v46 = vpop.f32.mrb[35].mxu0 }
 0xbef   :  { %3143 = vpow2.f32 %v2662_v23  ;;  %v2663_v47 = vmul.f32 -1.442695, %v1758_v24  ;;  %v4033_v23 = vld [vmem:[#allocation2 + $0x78] sm:$0xff]  }
 0xbf1   :  { %3145 = vpow2.f32 %v2663_v47 }
 0xbf9   :  { %v3144_v3 = vpop.eup %3143 }
 0xbfa   :  { %v1767_v37 = vadd.f32 1.0, %v3144_v3 }
 0xbfb   :  { %v3146_v42 = vpop.eup %3145 }
 0xbfc   :  { %3147 = vrcp.f32 %v1767_v37  ;;  %v1768_v21 = vadd.f32 1.0, %v3146_v42  ;;  %v4052_v37 = vld [vmem:[%s4298_s4 + $0x1] ss:$0 sm:$0xff] }
 0xbfd   :  { %v1641_v42 = vadd.f32 %v4052_v37, %v3998_v41  ;;  %v2667_v41 = vld [vmem:[%s4295_s1 + $0x30] sm:$0xff] }
 0xbfe   :  { %3149 = vrcp.f32 %v1768_v21 }
 0xc06   :  { %v3148_v50 = vpop.eup %3147 }
 0xc07   :  { %v1814_v52 = vmul.f32 %v3148_v50, %v1808_v22  ;;  %v1828_v9 = vsub.f32 1.0, %v3148_v50  ;;  %v1840_v56 = vmul.f32 %v3148_v50, %v3772_v54  ;;  %v4039_v54 = vld [vmem:[#allocation2 + $0x80] sm:$0xff]  }
 0xc08   :  { %v3150_v25 = vpop.eup %3149 }
 0xc09   :  { %1818 = vrot.lane.b32.xlu1 %v1814_v52, %s3222_s28  ;;  %v1815_v20 = vmul.f32 %v3150_v25, %v1811_v32  ;;  %v1829_v40 = vsub.f32 1.0, %v3150_v25  ;;  %v1841_v44 = vmul.f32 %v3150_v25, %v3774_v8  ;;  %v1644_v32 = vadd.f32 %v4052_v37, %v4000_v48 }
 0xc0a   :  { %v1647_v25 = vmax.f32 %v1641_v42, 0.0 }
 0xc0b   :  { %1820 = vrot.lane.b32.xlu0 %v1815_v20, %s3222_s28  ;;  %v1648_v20 = vmax.f32 %v1644_v32, 0.0 }
 0xc7b   :  { %v1819_v7 = vpop.permute.xlu1 %1818 }
 0xc7c   :  { %v1824_v26 = vadd.f32 %v1819_v7, %v1755_v34 }
 0xc7d   :  { %v1821_v38 = vpop.permute.xlu0 %1820 }
 0xc7e   :  { %3151 = vtanh.f32 %v1824_v26  ;;  %v1825_v39 = vadd.f32 %v1821_v38, %v1758_v24  ;;  %v4046_v24 = vld [vmem:[%s4298_s4 + $0x4] ss:$0 sm:$0xff] }
 0xc80   :  { %3153 = vtanh.f32 %v1825_v39 }
 0xc88   :  { %v3152_v62 = vpop.eup %3151 }
 0xc89   :  { %1832 = vrot.lane.b32.xlu1 %v3152_v62, %s3233_s21 }
 0xc8a   :  { %v3154_v61 = vpop.eup %3153 }
 0xc8b   :  { %1834 = vrot.lane.b32.xlu0 %v3154_v61, %s3233_s21 }
 0xcfb   :  { %v1833_v16 = vpop.permute.xlu1 %1832 }
 0xcfc   :  { %v1838_v14 = vmul.f32 %v1833_v16, %v1828_v9 }
 0xcfd   :  { %v1835_v11 = vpop.permute.xlu0 %1834 }
 0xcfe   :  { %v1839_v45 = vmul.f32 %v1835_v11, %v1829_v40  ;;  %v4022_v15 = vadd.f32 %v1840_v56, %v1838_v14  ;;  %v2668_v40 = vld [vmem:[%s4295_s1 + $0x38] sm:$0xff] }
 0xd00   :  { %v4024_v34 = vadd.f32 %v1841_v44, %v1839_v45 }
 0xd02   :  { %v1844_v35 = vpack.c.bf16 %v4024_v34, %v4022_v15  ;;  %v3073_v7 = vpack.i.bf16 %v4024_v34, %v4022_v15 }
 0xd04   :  { %1846 = vrot.lane.b32.xlu1 %v1844_v35, %s3233_s21 }
 0xd76   :  { %v4029_v36 = vpop.permute.xlu1 %1846 }
 0xd77   :  { %2941 = vmatmul.mubr.msk.bf16.vlgmr.msra.gmra.mrb[28].mxu1 %vm569_vm2, %v4029_v36 }
 0xd78   :  { %2945 = vmatpush3.bf16.msra.mxu1 %v4033_v23  ;;  %2948 = vmatprep.mubr.msk.bf16.mxu1 %vm3226_vm0, %v3225_v2 }
 0xd79   :  { %2946 = vmatprep.subr.bf16.mxu1 %v3225_v2 }
 0xd7c   :  { %2947 = vmatpush3.bf16.msra.mxu1 %v4039_v54 }
 0xd7d   :  { %2964 = vmatprep.subr.bf16.mxu1 %v3225_v2 }
 0xe4a   :  { %v1885_v8 = vpop.f32.mrb[28].mxu1 }
 0xe4b   :  { %v1886_v46 = vadd.f32 %v4046_v24, %v1885_v8  ;;  %v2942_v47 = vpop.f32.mrb[29].mxu1 }
 0xe4c   :  { %v1888_v3 = vpop.f32.mrb[30].mxu1 }
 0xe4d   :  { %v1892_v21 = vmax.f32 %v1886_v46, 0.0  ;;  %v1889_v22 = vadd.f32 %v4046_v24, %v1888_v3  ;;  %v2943_v50 = vpop.f32.mrb[31].mxu1 }
 0xe4f   :  { %v1893_v52 = vmax.f32 %v1889_v22, 0.0  ;;  %1896 = vrot.lane.b32.xlu0 %v1892_v21, %s3234_s22 }
 0xe51   :  { %1898 = vrot.lane.b32.xlu1 %v1893_v52, %s3234_s22 }
 0xe53   :  { %1906 = vrot.lane.b32.xlu0 %v1647_v25, %s3234_s22 }
 0xe55   :  { %1908 = vrot.lane.b32.xlu1 %v1648_v20, %s3234_s22 }
 0xe59   :  { %1967 = vperm.xlu1 %3062, %v2667_v41  }
 0xe5d   :  { %3074 = vrot.lane.b32.xlu1 %v3073_v7, %s3234_s22 }
 0xec1   :  { %v1897_v48 = vpop.permute.xlu0 %1896 }
 0xec2   :  { %v1902_v39 = vadd.f32 %v1897_v48, %v4022_v15 }
 0xec3   :  { %v1899_v26 = vpop.permute.xlu1 %1898 }
 0xec4   :  { %v1903_v62 = vadd.f32 %v1899_v26, %v4024_v34 }
 0xec5   :  { %v1907_v38 = vpop.permute.xlu0 %1906 }
 0xec6   :  { %v1912_v9 = vmul.f32 %v1907_v38, %v1902_v39 }
 0xec7   :  { %v1909_v61 = vpop.permute.xlu1 %1908 }
 0xec8   :  { %v1913_v16 = vmul.f32 %v1909_v61, %v1903_v62 }
 0xeca   :  { %v1914_v14 = vpack.c.bf16 %v1913_v16, %v1912_v9 }
 0xecc   :  { %1916 = vrot.lane.b32.xlu0 %v1914_v14, %s3233_s21 }
 0xed0   :  { %1972 = vperm.xlu0 %3056, %v2668_v40  }
 0xed8   :  { %v1968_v11 = vpop.permute.xlu1 %1967 }
 0xed9   :  { %v4076_v56 = vmul.f32 %v1968_v11, %v3360_v28 }
 0xedb   :  { %v1980_v44 = vand.u32 2139095040, %v4076_v56  ;;  %v1977_v22 = vand.u32 2147483647, %v4076_v56 }
 0xedd   :  { %v1981_v45 = vshrl.u32 %v1980_v44, 23  ;;  %v1984_v62 = vand.u32 8388607, %v1977_v22 }
 0xedf   :  { %v2669_v35 = vadd.s32 4294967169, %v1981_v45  ;;  %v1985_v11 = vor.u32 8388608, %v1984_v62 }
 0xee1   :  { %v1987_v8 = vadd.s32 1, %v2669_v35 }
 0xee3   :  { %vm1988_vm11 = vcmp.gt.s32.totalorder %v1987_v8, 0 }
 0xee4   :  { %v1989_v46 = vsel %vm1988_vm11, %v1987_v8, 0 }
 0xee5   :  { %v1991_v47 = vand.u32 31, %v1989_v46  ;;  %v1990_v50 = vshrl.u32 %v1989_v46, 5 }
 0xee7   :  { %v1992_v3 = vsub.s32 32, %v1991_v47  ;;  %v2003_v32 = vshll.u32 %v3230_v57, %v1991_v47  ;;  %v2006_v41 = vshll.u32 %v3231_v59, %v1991_v47  ;;  %v1994_v48 = vshll.u32 %v3227_v51, %v1991_v47 }
 0xee8   :  { %v1997_v26 = vshll.u32 %v3228_v53, %v1991_v47  ;;  %v2000_v38 = vshll.u32 %v3229_v55, %v1991_v47  ;;  %vm2012_vm12 = vcmp.lt.s32.totalorder %v1990_v50, 4  ;;  %vm2009_vm13 = vcmp.lt.s32.totalorder %v1990_v50, 1 }
 0xee9   :  { %v2004_v42 = vshrl.u32 %v3231_v59, %v1992_v3  ;;  %v2007_v21 = vshrl.u32 %v3232_v6, %v1992_v3  ;;  %v1995_v52 = vshrl.u32 %v3228_v53, %v1992_v3  ;;  %v1998_v25 = vshrl.u32 %v3229_v55, %v1992_v3 }
 0xeea   :  { %v2001_v20 = vshrl.u32 %v3230_v57, %v1992_v3  ;;  %vm2011_vm3 = vcmp.lt.s32.totalorder %v1990_v50, 3  ;;  %vm2010_vm4 = vcmp.lt.s32.totalorder %v1990_v50, 2 }
 0xeeb   :  { %v2005_v7 = vor.u32 %v2004_v42, %v2003_v32  ;;  %v2008_v39 = vor.u32 %v2007_v21, %v2006_v41  ;;  %v1996_v61 = vor.u32 %v1995_v52, %v1994_v48  ;;  %v1999_v9 = vor.u32 %v1998_v25, %v1997_v26 }
 0xeec   :  { %v2002_v16 = vor.u32 %v2001_v20, %v2000_v38  ;;  %v2025_v42 = vshll.u32 %v1985_v11, 8  ;;  %v1993_v41 = vshrl.u32 %v3227_v51, %v1992_v3 }
 0xeed   :  { %v2018_v14 = vsel %vm2012_vm12, %v2005_v7, 920167782  ;;  %v2022_v40 = vsel %vm2012_vm12, %v2008_v39, 1326507024  ;;  %v2017_v44 = vsel %vm2009_vm13, %v1996_v61, %v1999_v9 }
 0xeee   :  { %v2019_v45 = vsel %vm2011_vm3, %v2002_v16, %v2018_v14  ;;  %v2021_v35 = vsel %vm2009_vm13, %v1999_v9, %v2002_v16  ;;  %v2023_v8 = vsel %vm2011_vm3, %v2005_v7, %v2022_v40  ;;  %v2014_v20 = vsel %vm2012_vm12, %v2002_v16, 2102212464  ;;  %v2678_v16 = vld [vmem:[%s4294_s0 + $0x6] sm:$0x3] }
 0xeef   :  { %v2020_v46 = vsel %vm2010_vm4, %v2017_v44, %v2019_v45  ;;  %v2024_v47 = vsel %vm2010_vm4, %v2021_v35, %v2023_v8  ;;  %v2013_v48 = vsel %vm2009_vm13, %v1993_v41, %v1996_v61  ;;  %v2015_v26 = vsel %vm2011_vm3, %v1999_v9, %v2014_v20 }
 0xef0   :  { %v4098_v21 = vmul.u32.u64.low %v2025_v42, %v2020_v46  ;;  %v4099_v32 = vmul.u32.u64.high %v2025_v42, %v2020_v46, %v4098_v21  ;;  %v4102_v52 = vmul.u32.u64.low %v2025_v42, %v2024_v47  ;;  %v4103_v25 = vmul.u32.u64.high %v2025_v42, %v2024_v47, %v4102_v52 }
 0xef1   :  { %v2016_v38 = vsel %vm2010_vm4, %v2013_v48, %v2015_v26  ;;  %v2235_v50 = vrot.slane %v2678_v16, %v3285_v4  ;;  %v2239_v61 = vrot.slane %v2678_v16, %v3287_v5  ;;  %vm1979_vm13 = vcmp.lt.s32.totalorder %v4076_v56, 0 }
 0xef2   :  { %v2035_v7 = vadd.s32 1, %v4099_v32  ;;  %vm2034_vm5 = vc.u32 %v4103_v25, %v4098_v21  ;;  %v2032_v62 = vmul.u32 %v2025_v42, %v2016_v38  ;;  %vm4181_vm3 = vcmp.le.f32.partialorder %v1977_v22, 0.7853982 }
 0xef3   :  { %v2240_v11 = vpack.c.bf16 %v2239_v61, %v2235_v50 }
 0xef4   :  { %v2036_v39 = vsel %vm2034_vm5, %v2035_v7, %v4099_v32 }
 0xef5   :  { %v2037_v14 = vadd.s32 %v2036_v39, %v2032_v62 }
 0xef7   :  { %v2038_v3 = vadd.s32 536870912, %v2037_v14 }
 0xef9   :  { %v4123_v9 = vshrl.u32 %v2038_v3, 30 }
 0xefb   :  { %v2040_v44 = vshll.u32 %v4123_v9, 30 }
 0xefd   :  { %v4131_v4 = vsub.s32 %v2037_v14, %v2040_v44 }
 0xeff   :  { %v2043_v5 = vsub.s32 0, %v4131_v4 }
 0xf01   :  { %v2670_v35 = vmin.u32 %v2043_v5, %v4131_v4 }
 0xf03   :  { %v2045_v46 = vclz %v2670_v35 }
 0xf3e   :  { %v1917_v40 = vpop.permute.xlu0 %1916 }
 0xf3f   :  { %2949 = vmatmul.mubr.msk.bf16.vlgmr.msra.gmra.mrb[32].mxu1 %vm569_vm2, %v1917_v40 }
 0xf40   :  { %2965 = vmatpush3.bf16.msra.mxu1 %v3855_v1  ;;  %2966 = vmatprep.mubr.msk.bf16.mxu1 %vm3226_vm0, %v3225_v2 }
 0xf41   :  { %2970 = vmatprep.subr.bf16.mxu1 %v3225_v2 }
 0xf47   :  { %2967 = vmatmul.mubr.msk.bf16.vlgmr.msra.gmra.mrb[36].mxu1 %vm397_vm1, %v2240_v11 }
 0xf48   :  { %2971 = vmatpush3.bf16.msra.mxu1 %v3865_v0  ;;  %2982 = vmatprep.mubr.msk.bf16.mxu1 %vm3226_vm0, %v3225_v2 }
 0xf49   :  { %2972 = vmatprep.subr.bf16.mxu1 %v3225_v2 }
 0xf4c   :  { %2973 = vmatpush3.bf16.msra.mxu1 %v3873_v18 }
 0xf4d   :  { %2974 = vmatprep.subr.bf16.mxu1 %v3225_v2 }
 0xf4f   :  { %v1973_v1 = vpop.permute.xlu0 %1972 }
 0xf50   :  { %v4137_v45 = vmul.f32 %v1973_v1, %v3360_v28  ;;  %2975 = vmatpush3.bf16.msra.mxu1 %v3881_v12  ;;  %v2671_v12 = vadd.s32 4294967294, %v2045_v46 }
 0xf51   :  { %2976 = vmatprep.subr.bf16.mxu1 %v3225_v2 }
 0xf52   :  { %v2083_v0 = vand.u32 2139095040, %v4137_v45  ;;  %v2080_v28 = vand.u32 2147483647, %v4137_v45  ;;  %vm2672_vm6 = vcmp.lt.s32.totalorder %v2671_v12, 0  ;;  %vm2082_vm4 = vcmp.lt.s32.totalorder %v4137_v45, 0 }
 0xf54   :  { %v2084_v8 = vshrl.u32 %v2083_v0, 23  ;;  %2977 = vmatpush3.bf16.msra.mxu1 %v3887_v10  ;;  %v2087_v10 = vand.u32 8388607, %v2080_v28  ;;  %vm2081_vm5 = vcmp.le.f32.partialorder %v2080_v28, 0.7853982 }
 0xf55   :  { %2978 = vmatprep.subr.bf16.mxu1 %v3225_v2 }
 0xf56   :  { %v2673_v18 = vadd.s32 4294967169, %v2084_v8  ;;  %v2088_v16 = vor.u32 8388608, %v2087_v10 }
 0xf58   :  { %v2090_v47 = vadd.s32 1, %v2673_v18  ;;  %2979 = vmatpush3.bf16.msra.mxu1 %v3891_v17  ;;  %v2128_v35 = vshll.u32 %v2088_v16, 8 }
 0xf59   :  { %2980 = vmatprep.subr.bf16.mxu1 %v3225_v2 }
 0xf5a   :  { %vm2091_vm1 = vcmp.gt.s32.totalorder %v2090_v47, 0 }
 0xf5b   :  { %v2092_v42 = vsel %vm2091_vm1, %v2090_v47, 0 }
 0xf5c   :  { %v2094_v32 = vand.u32 31, %v2092_v42  ;;  %2981 = vmatpush3.bf16.msra.mxu1 %v3896_v58  ;;  %v2093_v20 = vshrl.u32 %v2092_v42, 5 }
 0xf5e   :  { %v2095_v52 = vsub.s32 32, %v2094_v32  ;;  %v2097_v41 = vshll.u32 %v3227_v51, %v2094_v32  ;;  %v2100_v17 = vshll.u32 %v3228_v53, %v2094_v32  ;;  %v2103_v7 = vshll.u32 %v3229_v55, %v2094_v32 }
 0xf5f   :  { %v2106_v58 = vshll.u32 %v3230_v57, %v2094_v32  ;;  %v2109_v62 = vshll.u32 %v3231_v59, %v2094_v32  ;;  %vm2112_vm7 = vcmp.lt.s32.totalorder %v2093_v20, 1  ;;  %vm2115_vm8 = vcmp.lt.s32.totalorder %v2093_v20, 4 }
 0xf60   :  { %v2098_v48 = vshrl.u32 %v3228_v53, %v2095_v52  ;;  %v2101_v26 = vshrl.u32 %v3229_v55, %v2095_v52  ;;  %v2104_v38 = vshrl.u32 %v3230_v57, %v2095_v52  ;;  %v2107_v39 = vshrl.u32 %v3231_v59, %v2095_v52 }
 0xf61   :  { %v2110_v14 = vshrl.u32 %v3232_v6, %v2095_v52  ;;  %v2048_v55 = vsel %vm2672_vm6, 0, %v2671_v12  ;;  %v2096_v57 = vshrl.u32 %v3227_v51, %v2095_v52  ;;  %vm2114_vm9 = vcmp.lt.s32.totalorder %v2093_v20, 3 }
 0xf62   :  { %v2099_v40 = vor.u32 %v2098_v48, %v2097_v41  ;;  %v2102_v3 = vor.u32 %v2101_v26, %v2100_v17  ;;  %v2105_v50 = vor.u32 %v2104_v38, %v2103_v7  ;;  %v2108_v61 = vor.u32 %v2107_v39, %v2106_v58 }
 0xf63   :  { %v2111_v53 = vor.u32 %v2110_v14, %v2109_v62  ;;  %vm2113_vm10 = vcmp.lt.s32.totalorder %v2093_v20, 2  ;;  %v2053_v41 = vsub.s32 4294967266, %v2048_v55  ;;  %v2049_v26 = vsub.s32 32, %v2048_v55 }
 0xf64   :  { %v2117_v11 = vsel %vm2115_vm8, %v2105_v50, 2102212464  ;;  %v2120_v44 = vsel %vm2112_vm7, %v2099_v40, %v2102_v3  ;;  %v2124_v5 = vsel %vm2112_vm7, %v2102_v3, %v2105_v50  ;;  %v2121_v1 = vsel %vm2115_vm8, %v2108_v61, 920167782 }
 0xf65   :  { %v2125_v59 = vsel %vm2115_vm8, %v2111_v53, 1326507024  ;;  %v2122_v6 = vsel %vm2114_vm9, %v2105_v50, %v2121_v1  ;;  %v2116_v8 = vsel %vm2112_vm7, %v2096_v57, %v2099_v40  ;;  %v2118_v18 = vsel %vm2114_vm9, %v2102_v3, %v2117_v11 }
 0xf66   :  { %v2126_v0 = vsel %vm2114_vm9, %v2108_v61, %v2125_v59  ;;  %v2123_v46 = vsel %vm2113_vm10, %v2120_v44, %v2122_v6  ;;  %v2119_v17 = vsel %vm2113_vm10, %v2116_v8, %v2118_v18  ;;  %v2054_v52 = vadd.s32 127, %v2053_v41 }
 0xf67   :  { %v2127_v47 = vsel %vm2113_vm10, %v2124_v5, %v2126_v0  ;;  %v4166_v12 = vmul.u32.u64.low %v2128_v35, %v2123_v46  ;;  %v4167_v10 = vmul.u32.u64.high %v2128_v35, %v2123_v46, %v4166_v12  ;;  %v2135_v20 = vmul.u32 %v2128_v35, %v2119_v17 }
 0xf68   :  { %v4163_v42 = vmul.u32.u64.low %v2128_v35, %v2127_v47  ;;  %v4164_v32 = vmul.u32.u64.high %v2128_v35, %v2127_v47, %v4163_v42  ;;  %v2033_v38 = vadd.s32 %v4098_v21, %v4103_v25  ;;  %v2055_v58 = vshll.u32 %v2054_v52, 23 }
 0xf69   :  { %v2138_v51 = vadd.s32 1, %v4167_v10  ;;  %v2050_v16 = vshll.u32 %v4131_v4, %v2048_v55 }
 0xf6a   :  { %vm2137_vm11 = vc.u32 %v4164_v32, %v4166_v12  ;;  %v2051_v62 = vshrl.u32 %v2033_v38, %v2049_v26  ;;  %v2056_v40 = vor.u32 4788187, %v2055_v58  ;;  %v2136_v25 = vadd.s32 %v4166_v12, %v4164_v32 }
 0xf6b   :  { %v2139_v48 = vsel %vm2137_vm11, %v2138_v51, %v4167_v10  ;;  %v2063_v51 = vsub.s32 4, %v4123_v9  ;;  %vm2069_vm11 = vweird.f32 %v4076_v56 }
 0xf6c   :  { %v2140_v7 = vadd.s32 %v2139_v48, %v2135_v20  ;;  %v2052_v50 = vor.u32 %v2051_v62, %v2050_v16  ;;  %v2057_v53 = vand.u32 2147483647, %v2056_v40 }
 0xf6d   :  { %v2064_v48 = vsel %vm1979_vm13, %v2063_v51, %v4123_v9 }
 0xf6e   :  { %v2141_v39 = vadd.s32 536870912, %v2140_v7  ;;  %v2059_v44 = vcvt.s32.f32 %v2052_v50  ;;  %v2066_v38 = vsel %vm4181_vm3, 0, %v2064_v48 }
 0xf6f   :  { %v2070_v62 = vand.u32 3, %v2066_v38 }
 0xf70   :  { %v2142_v14 = vshrl.u32 %v2141_v39, 30  ;;  %v2060_v57 = vmul.f32 %v2059_v44, %v2057_v53 }
 0xf71   :  { %vm2072_vm1 = vcmp.eq.s32.totalorder %v2070_v62, 0  ;;  %vm2075_vm6 = vcmp.eq.s32.totalorder %v2070_v62, 2  ;;  %vm2071_vm7 = vcmp.lt.s32.totalorder %v2070_v62, 2 }
 0xf72   :  { %v2143_v3 = vshll.u32 %v2142_v14, 30  ;;  %v2061_v6 = vxor.u32 2147483648, %v2060_v57  ;;  %v2166_v20 = vsub.s32 4, %v2142_v14 }
 0xf74   :  { %v2144_v61 = vsub.s32 %v2140_v7, %v2143_v3  ;;  %v2062_v4 = vsel %vm1979_vm13, %v2061_v6, %v2060_v57  ;;  %v2167_v58 = vsel %vm2082_vm4, %v2166_v20, %v2142_v14 }
 0xf75   :  { %v2065_v32 = vsel %vm4181_vm3, %v4076_v56, %v2062_v4  ;;  %v2169_v16 = vsel %vm2081_vm5, 0, %v2167_v58 }
 0xf76   :  { %v2146_v11 = vsub.s32 0, %v2144_v61  ;;  %3155 = vcosq.f32 %v2065_v32  ;;  %v2173_v3 = vand.u32 3, %v2169_v16 }
 0xf77   :  { %3157 = vsinq.f32 %v2065_v32 }
 0xf78   :  { %v2674_v5 = vmin.u32 %v2146_v11, %v2144_v61  ;;  %vm2178_vm8 = vcmp.eq.s32.totalorder %v2173_v3, 2  ;;  %vm2175_vm9 = vcmp.eq.s32.totalorder %v2173_v3, 0  ;;  %vm2174_vm10 = vcmp.lt.s32.totalorder %v2173_v3, 2 }
 0xf7a   :  { %v2148_v1 = vclz %v2674_v5 }
 0xf7c   :  { %v2675_v59 = vadd.s32 4294967294, %v2148_v1 }
 0xf7e   :  { %vm2676_vm12 = vcmp.lt.s32.totalorder %v2675_v59, 0 }
 0xf7f   :  { %v2151_v21 = vsel %vm2676_vm12, 0, %v2675_v59  ;;  %vm2172_vm12 = vweird.f32 %v4137_v45 }
 0xf80   :  { %v2152_v0 = vsub.s32 32, %v2151_v21  ;;  %v2156_v35 = vsub.s32 4294967266, %v2151_v21  ;;  %v2153_v55 = vshll.u32 %v2144_v61, %v2151_v21  ;;  %v3156_v7 = vpop.eup %3155 }
 0xf81   :  { %v3158_v39 = vpop.eup %3157  ;;  %v2076_v28 = vxor.u32 2147483648, %v3156_v7 }
 0xf82   :  { %v2154_v8 = vshrl.u32 %v2136_v25, %v2152_v0  ;;  %v2157_v18 = vadd.s32 127, %v2156_v35  ;;  %v2073_v40 = vxor.u32 2147483648, %v3158_v39 }
 0xf83   :  { %v2077_v9 = vsel %vm2075_vm6, %v2076_v28, %v3158_v39 }
 0xf84   :  { %v2155_v47 = vor.u32 %v2154_v8, %v2153_v55  ;;  %v2158_v42 = vshll.u32 %v2157_v18, 23  ;;  %v2074_v61 = vsel %vm2072_vm1, %v3156_v7, %v2073_v40 }
 0xf85   :  { %v2078_v5 = vsel %vm2071_vm7, %v2074_v61, %v2077_v9 }
 0xf86   :  { %v2159_v12 = vor.u32 4788187, %v2158_v42  ;;  %v2162_v41 = vcvt.s32.f32 %v2155_v47  ;;  %v2079_v59 = vsel %vm2069_vm11, nan, %v2078_v5 }
 0xf88   :  { %v2160_v10 = vand.u32 2147483647, %v2159_v12 }
 0xf8a   :  { %v2163_v17 = vmul.f32 %v2162_v41, %v2160_v10 }
 0xf8c   :  { %v2164_v52 = vxor.u32 2147483648, %v2163_v17 }
 0xf8e   :  { %v2165_v22 = vsel %vm2082_vm4, %v2164_v52, %v2163_v17 }
 0xf8f   :  { %v2168_v26 = vsel %vm2081_vm5, %v4137_v45, %v2165_v22 }
 0xf90   :  { %3159 = vcosq.f32 %v2168_v26 }
 0xf91   :  { %3161 = vsinq.f32 %v2168_v26 }
 0xf9a   :  { %v3160_v50 = vpop.eup %3159 }
 0xf9b   :  { %v3162_v53 = vpop.eup %3161  ;;  %v2179_v11 = vxor.u32 2147483648, %v3160_v50 }
 0xf9c   :  { %v2176_v44 = vxor.u32 2147483648, %v3162_v53 }
 0xf9d   :  { %v2180_v57 = vsel %vm2178_vm8, %v2179_v11, %v3162_v53 }
 0xf9e   :  { %v2177_v14 = vsel %vm2175_vm9, %v3160_v50, %v2176_v44 }
 0xf9f   :  { %v2181_v1 = vsel %vm2174_vm10, %v2177_v14, %v2180_v57 }
 0xfa0   :  { %v2182_v6 = vsel %vm2172_vm12, nan, %v2181_v1 }
 0xfa1   :  { %v2183_v21 = vpack.c.bf16 %v2182_v6, %v2079_v59 }
 0xfa3   :  { %2961 = vmatmul.mubr.msk.bf16.vlgmr.msra.gmra.mrb[36].mxu0 %vm330_vm14, %v2183_v21 }
 0xfa4   :  { %2987 = vmatpush3.bf16.msra.mxu0 %v3952_v19  ;;  %2990 = vmatprep.mubr.msk.bf16.mxu0 %vm3226_vm0, %v3225_v2 }
 0xfa5   :  { %2988 = vmatprep.subr.bf16.mxu0 %v3225_v2 }
 0xfa8   :  { %2989 = vmatpush3.bf16.msra.mxu0 %v3958_v33 }
 0xfa9   :  { %2994 = vmatprep.subr.bf16.mxu0 %v3225_v2 }
 0xfab   :  { %2991 = vmatmul.mubr.msk.bf16.vlgmr.msra.gmra.mrb[40].mxu0 %vm569_vm2, %v4029_v36 }
 0xfac   :  { %2995 = vmatpush3.bf16.msra.mxu0 %v3964_v43  ;;  %2998 = vmatprep.mubr.msk.bf16.mxu0 %vm3226_vm0, %v3225_v2  ;;  %v3075_v43 = vpop.permute.xlu1 %3074 }
 0xfad   :  { %2996 = vmatprep.subr.bf16.mxu0 %v3225_v2  ;;  %v3077_v18 = vunpack.i.h.bf16 %v3075_v43 }
 0xfb0   :  { %2997 = vmatpush3.bf16.msra.mxu0 %v3970_v49  ;;  %v3076_v49 = vunpack.i.l.bf16 %v3075_v43 }
 0xfb1   :  { %3002 = vmatprep.subr.bf16.mxu0 %v3225_v2 }
0x1012   :  { %v4215_v19 = vpop.f32.mrb[32].mxu1 }
0x1013   :  { %v2950_v56 = vpop.f32.mrb[33].mxu1 }
0x1014   :  { %v4217_v33 = vpop.f32.mrb[34].mxu1 }
0x1015   :  { %v2951_v45 = vpop.f32.mrb[35].mxu1 }
0x101a   :  { %v2278_v25 = vpop.f32.mrb[36].mxu1 }
0x101b   :  { %v2279_v36 = vadd.f32 %v3981_v13, %v2278_v25  ;;  %v2968_v0 = vpop.f32.mrb[37].mxu1 }
0x101c   :  { %v2281_v35 = vpop.f32.mrb[38].mxu1 }
0x101d   :  { %v2285_v4 = vmax.f32 %v2279_v36, 0.0  ;;  %v2282_v55 = vadd.f32 %v3981_v13, %v2281_v35  ;;  %v2969_v8 = vpop.f32.mrb[39].mxu1 }
0x101f   :  { %v2286_v46 = vmax.f32 %v2282_v55, 0.0  ;;  %v2295_v47 = vsel %vm330_vm14, %v2285_v4, %v3076_v49 }
0x1021   :  { %v2296_v42 = vsel %vm330_vm14, %v2286_v46, %v3077_v18 }
0x1022   :  { %v2297_v32 = vpack.c.bf16 %v2296_v42, %v2295_v47 }
0x1024   :  { %2983 = vmatmul.mubr.msk.bf16.vlgmr.msra.gmra.mrb[40].mxu1 %vm495_vm15, %v2297_v32 }
0x1076   :  { %v4224_v12 = vpop.f32.mrb[36].mxu0 }
0x1077   :  { %v2962_v10 = vpop.f32.mrb[37].mxu0  ;;  %v2222_v49 = vadd.f32 %v4052_v37, %v4224_v12  ;;  %v2625_v12 = vld [vmem:[%s4298_s4 + $0x5] ss:$0 sm:$0xff] }
0x1078   :  { %v4226_v41 = vpop.f32.mrb[38].mxu0 }
0x1079   :  { %v2963_v17 = vpop.f32.mrb[39].mxu0 }
0x107e   :  { %v2388_v51 = vpop.f32.mrb[40].mxu0 }
0x107f   :  { %v2992_v52 = vpop.f32.mrb[41].mxu0  ;;  %v2389_v50 = vadd.f32 %v4012_v60, %v2388_v51 }
0x1080   :  { %v2391_v13 = vpop.f32.mrb[42].mxu0 }
0x1081   :  { %v2993_v22 = vpop.f32.mrb[43].mxu0  ;;  %v2392_v9 = vadd.f32 %v4012_v60, %v2391_v13 }
0x10f7   :  { %v2335_v20 = vpop.f32.mrb[40].mxu1 }
0x10f8   :  { %v2336_v48 = vadd.f32 %v4005_v63, %v2335_v20  ;;  %v2984_v26 = vpop.f32.mrb[41].mxu1 }
0x10f9   :  { %v2338_v7 = vpop.f32.mrb[42].mxu1  ;;  %v1378_v26 = vadd.f32 %v2625_v12, %v3976_v29 }
0x10fa   :  { %v2681_v38 = vmul.f32 -1.442695, %v2336_v48  ;;  %v2339_v58 = vadd.f32 %v4005_v63, %v2338_v7  ;;  %v2985_v39 = vpop.f32.mrb[43].mxu1 }
0x10fc   :  { %3163 = vpow2.f32 %v2681_v38  ;;  %v2682_v62 = vmul.f32 -1.442695, %v2339_v58 }
0x10fe   :  { %3165 = vpow2.f32 %v2682_v62 }
0x1106   :  { %v3164_v16 = vpop.eup %3163 }
0x1107   :  { %v2348_v40 = vadd.f32 1.0, %v3164_v16 }
0x1108   :  { %v3166_v28 = vpop.eup %3165 }
0x1109   :  { %3167 = vrcp.f32 %v2348_v40  ;;  %v2349_v3 = vadd.f32 1.0, %v3166_v28  ;;  %v794_v28 = vadd.f32 %v2625_v12, %v3731_v27 }
0x110b   :  { %3169 = vrcp.f32 %v2349_v3 }
0x1113   :  { %v3168_v61 = vpop.eup %3167 }
0x1114   :  { %v2395_v53 = vmul.f32 %v3168_v61, %v2389_v50  ;;  %v2409_v60 = vsub.f32 1.0, %v3168_v61  ;;  %v2421_v25 = vmul.f32 %v3168_v61, %v4022_v15  ;;  %v797_v50 = vadd.f32 %v2625_v12, %v3733_v30 }
0x1115   :  { %v3170_v11 = vpop.eup %3169 }
0x1116   :  { %2399 = vrot.lane.b32.xlu0 %v2395_v53, %s3222_s28  ;;  %v2396_v63 = vmul.f32 %v3170_v11, %v2392_v9  ;;  %v2410_v56 = vsub.f32 1.0, %v3170_v11  ;;  %v2422_v36 = vmul.f32 %v3170_v11, %v4024_v34 }
0x1118   :  { %2401 = vrot.lane.b32.xlu1 %v2396_v63, %s3222_s28 }
0x1188   :  { %v2400_v44 = vpop.permute.xlu0 %2399 }
0x1189   :  { %v2405_v5 = vadd.f32 %v2400_v44, %v2336_v48 }
0x118a   :  { %v2402_v57 = vpop.permute.xlu1 %2401 }
0x118b   :  { %3171 = vtanh.f32 %v2405_v5  ;;  %v2406_v14 = vadd.f32 %v2402_v57, %v2339_v58 }
0x118d   :  { %3173 = vtanh.f32 %v2406_v14 }
0x1195   :  { %v3172_v1 = vpop.eup %3171 }
0x1196   :  { %2413 = vrot.lane.b32.xlu0 %v3172_v1, %s3233_s21 }
0x1197   :  { %v3174_v59 = vpop.eup %3173 }
0x1198   :  { %2415 = vrot.lane.b32.xlu1 %v3174_v59, %s3233_s21 }
0x1208   :  { %v2414_v6 = vpop.permute.xlu0 %2413 }
0x1209   :  { %v2419_v21 = vmul.f32 %v2414_v6, %v2409_v60 }
0x120a   :  { %v2416_v45 = vpop.permute.xlu1 %2415 }
0x120b   :  { %v2420_v0 = vmul.f32 %v2416_v45, %v2410_v56  ;;  %v2423_v43 = vadd.f32 %v2421_v25, %v2419_v21 }
0x120d   :  { %v2424_v35 = vadd.f32 %v2422_v36, %v2420_v0 }
0x120f   :  { %v2425_v4 = vpack.c.bf16 %v2424_v35, %v2423_v43 }
0x1211   :  { %2427 = vrot.lane.b32.xlu0 %v2425_v4, %s3233_s21 }
0x1283   :  { %v2428_v55 = vpop.permute.xlu0 %2427 }
0x1284   :  { %2999 = vmatmul.mubr.msk.bf16.vlgmr.msra.gmra.mrb[44].mxu0 %vm569_vm2, %v2428_v55 }
0x1285   :  { %3003 = vmatpush3.bf16.msra.mxu0 %v4033_v23  ;;  %3006 = vmatprep.mubr.msk.bf16.mxu0 %vm3226_vm0, %v3225_v2  ;;  %v2225_v23 = vadd.f32 %v4052_v37, %v4226_v41  ;;  %v1956_v37 = vadd.f32 %v2625_v12, %v4215_v19 }
0x1286   :  { %3004 = vmatprep.subr.bf16.mxu0 %v3225_v2  ;;  %v2228_v2 = vmax.f32 %v2222_v49, 0.0 }
0x1289   :  { %3005 = vmatpush3.bf16.msra.mxu0 %v4039_v54  ;;  %v2229_v54 = vmax.f32 %v2225_v23, 0.0 }
0x1357   :  { %v2466_v15 = vpop.f32.mrb[44].mxu0 }
0x1358   :  { %v2467_v34 = vadd.f32 %v4046_v24, %v2466_v15  ;;  %v3000_v8 = vpop.f32.mrb[45].mxu0 }
0x1359   :  { %v2469_v18 = vpop.f32.mrb[46].mxu0 }
0x135a   :  { %v2473_v46 = vmax.f32 %v2467_v34, 0.0  ;;  %v2470_v47 = vadd.f32 %v4046_v24, %v2469_v18  ;;  %v3001_v42 = vpop.f32.mrb[47].mxu0  ;;  %v1375_v24 = vadd.f32 %v2625_v12, %v3974_v31  ;;  %v1959_v31 = vadd.f32 %v2625_v12, %v4217_v33 }
0x135c   :  { %v2474_v32 = vmax.f32 %v2470_v47, 0.0  ;;  %2477 = vrot.lane.b32.xlu1 %v2473_v46, %s3234_s22 }
0x135e   :  { %2479 = vrot.lane.b32.xlu0 %v2474_v32, %s3234_s22 }
0x1360   :  { %2487 = vrot.lane.b32.xlu1 %v2228_v2, %s3234_s22 }
0x1362   :  { %2489 = vrot.lane.b32.xlu0 %v2229_v54, %s3234_s22 }
0x1366   :  { %2545 = vrot.lane.b32.xlu0 %v1375_v24, %s3234_s22 }
0x136a   :  { %2553 = vrot.lane.b32.xlu0 %v1956_v37, %s3222_s28 }
0x13ce   :  { %v2478_v10 = vpop.permute.xlu1 %2477 }
0x13cf   :  { %v2483_v51 = vadd.f32 %v2478_v10, %v2423_v43 }
0x13d0   :  { %v2480_v41 = vpop.permute.xlu0 %2479 }
0x13d1   :  { %v2484_v52 = vadd.f32 %v2480_v41, %v2424_v35 }
0x13d2   :  { %v2488_v17 = vpop.permute.xlu1 %2487 }
0x13d3   :  { %v2493_v22 = vmul.f32 %v2488_v17, %v2483_v51 }
0x13d4   :  { %v2490_v13 = vpop.permute.xlu0 %2489 }
0x13d5   :  { %v2494_v20 = vmul.f32 %v2490_v13, %v2484_v52 }
0x13d7   :  { %v2495_v48 = vpack.c.bf16 %v2494_v20, %v2493_v22 }
0x13d8   :  { %v2546_v29 = vpop.permute.xlu0 %2545 }
0x13d9   :  { %2497 = vrot.lane.b32.xlu1 %v2495_v48, %s3233_s21  ;;  %v2575_v61 = vsel %vm569_vm2, %v794_v28, %v2546_v29 }
0x13dc   :  { %v2554_v40 = vpop.permute.xlu0 %2553 }
0x13dd   :  { %2547 = vrot.lane.b32.xlu1 %v1378_v26, %s3234_s22  ;;  %v2577_v9 = vsel %vm330_vm14, %v2575_v61, %v2554_v40 }
0x13e1   :  { %2555 = vrot.lane.b32.xlu1 %v1959_v31, %s3222_s28 }
0x144b   :  { %v2498_v19 = vpop.permute.xlu1 %2497 }
0x144c   :  { %3007 = vmatmul.mubr.msk.bf16.vlgmr.msra.gmra.mrb[48].mxu0 %vm569_vm2, %v2498_v19 }
0x144f   :  { %v2548_v33 = vpop.permute.xlu1 %2547 }
0x1450   :  { %v2576_v11 = vsel %vm569_vm2, %v797_v50, %v2548_v33 }
0x1453   :  { %v2556_v3 = vpop.permute.xlu1 %2555 }
0x1454   :  { %v2578_v44 = vsel %vm330_vm14, %v2576_v11, %v2556_v3 }
0x151f   :  { %v2536_v7 = vpop.f32.mrb[48].mxu0 }
0x1520   :  { %v2537_v38 = vadd.f32 %v2625_v12, %v2536_v7  ;;  %v3008_v58 = vpop.f32.mrb[49].mxu0 }
0x1521   :  { %v2539_v39 = vpop.f32.mrb[50].mxu0 }
0x1522   :  { %v2540_v62 = vadd.f32 %v2625_v12, %v2539_v39  ;;  %2561 = vrot.lane.b32.xlu0 %v2537_v38, %s3233_s21  ;;  %v3009_v16 = vpop.f32.mrb[51].mxu0 }
0x1524   :  { %2563 = vrot.lane.b32.xlu1 %v2540_v62, %s3233_s21 }
0x1526   :  { %2569 = vrot.lane.b32.xlu0 %v2423_v43, %s3233_s21 }
0x1528   :  { %2571 = vrot.lane.b32.xlu1 %v2424_v35, %s3233_s21 }
0x1594   :  { %v2562_v53 = vpop.permute.xlu0 %2561 }
0x1595   :  { %v2579_v63 = vsel %vm495_vm15, %v2577_v9, %v2562_v53 }
0x1596   :  { %2581 = vst [vmem:[%s4299_s5] sm:$0xff] %v2579_v63  ;;  %v2564_v5 = vpop.permute.xlu1 %2563 }
0x1597   :  { %v2580_v27 = vsel %vm495_vm15, %v2578_v44, %v2564_v5 }
0x1598   :  { %2583 = vst [vmem:[%s4299_s5 + $0x10] sm:$0xff] %v2580_v27  ;;  %v2570_v30 = vpop.permute.xlu0 %2569 }
0x1599   :  { %2582 = vst.msk [vmem:[%s4299_s5 + $0x8] sm:$0xff] %vm569_vm2, %v2570_v30 }
0x159a   :  { %v2572_v57 = vpop.permute.xlu1 %2571 }
0x159b   :  { %2584 = vst.msk [vmem:[%s4299_s5 + $0x18] sm:$0xff] %vm569_vm2, %v2572_v57 }
0x159c   :  { %2589 = vsyncpa [#allocation3], 1 }

</bundles_post_ra>
